<compile_context>
chip_gen: v6e
topology: v6e:2x2x1
jax: 0.10.0
libtpu: 0.0.40
codegen_flags: <defaults>
</compile_context>

<pallas_src>
import functools

import jax
import jax.numpy as jnp
from jax.experimental import pallas as pl
from jax.experimental.pallas import tpu as pltpu


def _gcn_fused_kernel(x_ref, a_ref, w_ref, b_ref, o_ref, h_ref, *,
                      order, c_in, c_out, seq_len):
    """Fused diffusion + concat + 1x1-conv for one batch element.

    x_ref : (1, L*C, V)       bf16 input, row index = l*C + c, lanes = node v
    a_ref : (S, V, V)         bf16 support matrices (original orientation)
    w_ref : (c_out, G*C)      bf16 1x1-conv weight (NO expansion), cols = (g, c)
    b_ref : (c_out, 1)        f32 bias
    o_ref : (1, L*c_out, V)   f32 output block, row index = l*c_out + o (lane-dense V)
    h_ref : (L*G*C, V)        f32 VMEM scratch, row index = l*(G*C) + g*C + c
    """
    L, C = seq_len, c_in
    S = a_ref.shape[0]
    GC = (order * S + 1) * C                     # concatenated channel count

    x2 = x_ref[0]                                # (L*C, V) bf16
    x2_f32 = x2.astype(jnp.float32)

    # ---- group 0 (identity channels): scatter into scratch rows (l, g=0, c) ----
    for l in range(L):
        h_ref[l * GC:l * GC + C, :] = x2_f32[l * C:(l + 1) * C, :]

    # ---- diffusion: one (L*C, V) @ (V, V) MXU matmul per hop; slab never leaves VMEM ----
    for s in range(S):
        a_s = a_ref[s]                           # (V, V) bf16
        cur = x2
        for k in range(order):
            hop = jnp.dot(cur, a_s, preferred_element_type=jnp.float32)   # (L*C, V) f32
            g = 1 + s * order + k                # PyTorch torch.cat group order
            for l in range(L):
                h_ref[l * GC + g * C:l * GC + (g + 1) * C, :] = hop[l * C:(l + 1) * C, :]
            cur = hop.astype(x2.dtype)           # bf16 operand for the next hop

    # ---- fused 1x1 conv: per time step one (c_out, G*C) @ (G*C, V) matmul -> output ----
    w = w_ref[...]                               # (c_out, GC) bf16
    b = b_ref[...]                               # (c_out, 1)  f32
    for l in range(L):
        h_l = h_ref[l * GC:(l + 1) * GC, :].astype(w.dtype)               # (GC, V) bf16
        y = jnp.dot(w, h_l, preferred_element_type=jnp.float32) + b       # (c_out, V) f32
        o_ref[0, l * c_out:(l + 1) * c_out, :] = y.astype(o_ref.dtype)

    # TODO(synk): F.dropout in training mode (stochastic) is not implemented; eval-mode
    # identity semantics are used (pltpu.prng_seed/prng_random_bits would be the hook).


@functools.partial(jax.jit, static_argnames=("order",))
def gcn_forward(x, supports, weight, bias, *, order=2):
    """x: (N,C,V,L); supports: list of (V,V); weight: (c_out, c_total); bias: (c_out,)."""
    N, C, V, L = x.shape
    S = len(supports)
    c_out, c_total = weight.shape
    n_groups = order * S + 1
    assert c_total == n_groups * C

    # ---- one-time, input/weight-sized layout prep (bf16 MXU operands, no expansion) ----
    # x_t[n, l*C + c, v] = x[n, c, v, l]
    x_t = jnp.transpose(x, (0, 3, 1, 2)).reshape(N, L * C, V).astype(jnp.bfloat16)
    a_stack = jnp.stack(supports, axis=0).astype(jnp.bfloat16)          # (S, V, V)
    w_bf = weight.astype(jnp.bfloat16)                                  # (c_out, G*C)
    b2 = bias.astype(jnp.float32).reshape(c_out, 1)

    kernel = functools.partial(_gcn_fused_kernel, order=order, c_in=C,
                               c_out=c_out, seq_len=L)

    out = pl.pallas_call(
        kernel,
        out_shape=jax.ShapeDtypeStruct((N, L * c_out, V), x.dtype),
        grid_spec=pltpu.PrefetchScalarGridSpec(
            num_scalar_prefetch=0,
            grid=(N,),
            in_specs=[
                pl.BlockSpec((1, L * C, V), lambda n: (n, 0, 0)),
                pl.BlockSpec((S, V, V), lambda n: (0, 0, 0)),
                pl.BlockSpec((c_out, n_groups * C), lambda n: (0, 0)),
                pl.BlockSpec((c_out, 1), lambda n: (0, 0)),
            ],
            out_specs=pl.BlockSpec((1, L * c_out, V), lambda n: (n, 0, 0)),
            scratch_shapes=[pltpu.VMEM((L * n_groups * C, V), jnp.float32)],
        ),
        compiler_params=pltpu.CompilerParams(
            dimension_semantics=("parallel",),
            vmem_limit_bytes=64 << 20,
        ),
    )(x_t, a_stack, w_bf, b2)

    # kernel output rows are (l, o) with lanes = v; single output-sized permute to NCVL.
    return out.reshape(N, L, c_out, V).transpose(0, 2, 3, 1)


def gcn_reference(x, supports, weight, bias, *, order=2):
    """Pure-JAX (f32) mirror of the PyTorch forward (eval mode)."""
    out = [x]
    for a in supports:
        x1 = jnp.einsum('ncvl,vw->ncwl', x, a)
        out.append(x1)
        for _ in range(2, order + 1):
            x2 = jnp.einsum('ncvl,vw->ncwl', x1, a)
            out.append(x2)
            x1 = x2
    h = jnp.concatenate(out, axis=1)
    y = jnp.einsum('oc,ncvl->novl', weight, h) + bias[None, :, None, None]
    return y


if __name__ == "__main__":
    N, C_IN, C_OUT, V, L = 2, 4, 8, 16, 16
    SUPPORT_LEN, ORDER = 3, 2
    C_TOTAL = (ORDER * SUPPORT_LEN + 1) * C_IN   # 28

    key = jax.random.PRNGKey(0)
    keys = jax.random.split(key, 3 + SUPPORT_LEN)

    x = jax.random.normal(keys[0], (N, C_IN, V, L), jnp.float32)
    supports = [
        jax.nn.softmax(jax.random.normal(keys[3 + s], (V, V), jnp.float32), axis=1)
        for s in range(SUPPORT_LEN)
    ]
    # Conv2d(c_total, c_out, kernel_size=(1,1)) parameters (1x1 kernel dims squeezed).
    weight = 0.1 * jax.random.normal(keys[1], (C_OUT, C_TOTAL), jnp.float32)
    bias = 0.1 * jax.random.normal(keys[2], (C_OUT,), jnp.float32)

    out = gcn_forward(x, supports, weight, bias, order=ORDER)
    out = jax.block_until_ready(out)

    ref = gcn_reference(x, supports, weight, bias, order=ORDER)
    assert out.shape == (N, C_OUT, V, L), out.shape
    max_err = float(jnp.max(jnp.abs(out - ref)))
    # bf16 MXU operands (f32 accumulation) -> relaxed tolerance vs the f32 reference.
    assert jnp.allclose(out, ref, rtol=3e-2, atol=3e-2), f"mismatch vs reference (max abs err {max_err})"

    print("KERNEL_OK")
</pallas_src>

<mosaic_0001>
module attributes {stable_mosaic.version = 11 : i64} {
  func.func @_gcn_fused_kernel(%arg0: i32, %arg1: memref<1x64x16xbf16, #tpu.memory_space<vmem>>, %arg2: memref<3x16x16xbf16, #tpu.memory_space<vmem>>, %arg3: memref<8x28xbf16, #tpu.memory_space<vmem>>, %arg4: memref<8x1xf32, #tpu.memory_space<vmem>>, %arg5: memref<1x128x16xf32, #tpu.memory_space<vmem>>, %arg6: memref<448x16xf32, #tpu.memory_space<vmem>>) attributes {dimension_semantics = [#tpu.dimension_semantics<parallel>], iteration_bounds = array<i64: 2>, scalar_prefetch = 0 : i64, scratch_operands = 1 : i64, tpu.core_type = #tpu.core_type<tc>, window_params = [{transform_indices = @transform_0, window_bounds = array<i64: 1, 64, 16>}, {pipeline_mode = #tpu.pipeline_mode<synchronous>, transform_indices = @transform_1, window_bounds = array<i64: 3, 16, 16>}, {pipeline_mode = #tpu.pipeline_mode<synchronous>, transform_indices = @transform_2, window_bounds = array<i64: 8, 28>}, {pipeline_mode = #tpu.pipeline_mode<synchronous>, transform_indices = @transform_3, window_bounds = array<i64: 8, 1>}, {transform_indices = @transform_4, window_bounds = array<i64: 1, 128, 16>}]} {
    %c0 = arith.constant 0 : index
    %c0_0 = arith.constant 0 : index
    %c0_1 = arith.constant 0 : index
    %0 = vector.load %arg1[%c0, %c0_0, %c0_1] : memref<1x64x16xbf16, #tpu.memory_space<vmem>>, vector<1x64x16xbf16>
    %1 = vector.shape_cast %0 : vector<1x64x16xbf16> to vector<64x16xbf16>
    %2 = arith.extf %1 : vector<64x16xbf16> to vector<64x16xf32>
    %3 = vector.extract_strided_slice %2 {offsets = [0, 0], sizes = [4, 16], strides = [1, 1]} : vector<64x16xf32> to vector<4x16xf32>
    %c0_2 = arith.constant 0 : index
    %c0_3 = arith.constant 0 : index
    %4 = vector.load %arg6[%c0_2, %c0_3] : memref<448x16xf32, #tpu.memory_space<vmem>>, vector<4x16xf32>
    tpu.vector_store %arg6[%c0_2, %c0_3], %3 {strides = array<i32>} : memref<448x16xf32, #tpu.memory_space<vmem>>, vector<4x16xf32>,
    %5 = vector.extract_strided_slice %2 {offsets = [4, 0], sizes = [4, 16], strides = [1, 1]} : vector<64x16xf32> to vector<4x16xf32>
    %c28 = arith.constant 28 : index
    %c0_4 = arith.constant 0 : index
    %6 = vector.load %arg6[%c28, %c0_4] : memref<448x16xf32, #tpu.memory_space<vmem>>, vector<4x16xf32>
    tpu.vector_store %arg6[%c28, %c0_4], %5 {strides = array<i32>} : memref<448x16xf32, #tpu.memory_space<vmem>>, vector<4x16xf32>,
    %7 = vector.extract_strided_slice %2 {offsets = [8, 0], sizes = [4, 16], strides = [1, 1]} : vector<64x16xf32> to vector<4x16xf32>
    %c56 = arith.constant 56 : index
    %c0_5 = arith.constant 0 : index
    %8 = vector.load %arg6[%c56, %c0_5] : memref<448x16xf32, #tpu.memory_space<vmem>>, vector<4x16xf32>
    tpu.vector_store %arg6[%c56, %c0_5], %7 {strides = array<i32>} : memref<448x16xf32, #tpu.memory_space<vmem>>, vector<4x16xf32>,
    %9 = vector.extract_strided_slice %2 {offsets = [12, 0], sizes = [4, 16], strides = [1, 1]} : vector<64x16xf32> to vector<4x16xf32>
    %c84 = arith.constant 84 : index
    %c0_6 = arith.constant 0 : index
    %10 = vector.load %arg6[%c84, %c0_6] : memref<448x16xf32, #tpu.memory_space<vmem>>, vector<4x16xf32>
    tpu.vector_store %arg6[%c84, %c0_6], %9 {strides = array<i32>} : memref<448x16xf32, #tpu.memory_space<vmem>>, vector<4x16xf32>,
    %11 = vector.extract_strided_slice %2 {offsets = [16, 0], sizes = [4, 16], strides = [1, 1]} : vector<64x16xf32> to vector<4x16xf32>
    %c112 = arith.constant 112 : index
    %c0_7 = arith.constant 0 : index
    %12 = vector.load %arg6[%c112, %c0_7] : memref<448x16xf32, #tpu.memory_space<vmem>>, vector<4x16xf32>
    tpu.vector_store %arg6[%c112, %c0_7], %11 {strides = array<i32>} : memref<448x16xf32, #tpu.memory_space<vmem>>, vector<4x16xf32>,
    %13 = vector.extract_strided_slice %2 {offsets = [20, 0], sizes = [4, 16], strides = [1, 1]} : vector<64x16xf32> to vector<4x16xf32>
    %c140 = arith.constant 140 : index
    %c0_8 = arith.constant 0 : index
    %14 = vector.load %arg6[%c140, %c0_8] : memref<448x16xf32, #tpu.memory_space<vmem>>, vector<4x16xf32>
    tpu.vector_store %arg6[%c140, %c0_8], %13 {strides = array<i32>} : memref<448x16xf32, #tpu.memory_space<vmem>>, vector<4x16xf32>,
    %15 = vector.extract_strided_slice %2 {offsets = [24, 0], sizes = [4, 16], strides = [1, 1]} : vector<64x16xf32> to vector<4x16xf32>
    %c168 = arith.constant 168 : index
    %c0_9 = arith.constant 0 : index
    %16 = vector.load %arg6[%c168, %c0_9] : memref<448x16xf32, #tpu.memory_space<vmem>>, vector<4x16xf32>
    tpu.vector_store %arg6[%c168, %c0_9], %15 {strides = array<i32>} : memref<448x16xf32, #tpu.memory_space<vmem>>, vector<4x16xf32>,
    %17 = vector.extract_strided_slice %2 {offsets = [28, 0], sizes = [4, 16], strides = [1, 1]} : vector<64x16xf32> to vector<4x16xf32>
    %c196 = arith.constant 196 : index
    %c0_10 = arith.constant 0 : index
    %18 = vector.load %arg6[%c196, %c0_10] : memref<448x16xf32, #tpu.memory_space<vmem>>, vector<4x16xf32>
    tpu.vector_store %arg6[%c196, %c0_10], %17 {strides = array<i32>} : memref<448x16xf32, #tpu.memory_space<vmem>>, vector<4x16xf32>,
    %19 = vector.extract_strided_slice %2 {offsets = [32, 0], sizes = [4, 16], strides = [1, 1]} : vector<64x16xf32> to vector<4x16xf32>
    %c224 = arith.constant 224 : index
    %c0_11 = arith.constant 0 : index
    %20 = vector.load %arg6[%c224, %c0_11] : memref<448x16xf32, #tpu.memory_space<vmem>>, vector<4x16xf32>
    tpu.vector_store %arg6[%c224, %c0_11], %19 {strides = array<i32>} : memref<448x16xf32, #tpu.memory_space<vmem>>, vector<4x16xf32>,
    %21 = vector.extract_strided_slice %2 {offsets = [36, 0], sizes = [4, 16], strides = [1, 1]} : vector<64x16xf32> to vector<4x16xf32>
    %c252 = arith.constant 252 : index
    %c0_12 = arith.constant 0 : index
    %22 = vector.load %arg6[%c252, %c0_12] : memref<448x16xf32, #tpu.memory_space<vmem>>, vector<4x16xf32>
    tpu.vector_store %arg6[%c252, %c0_12], %21 {strides = array<i32>} : memref<448x16xf32, #tpu.memory_space<vmem>>, vector<4x16xf32>,
    %23 = vector.extract_strided_slice %2 {offsets = [40, 0], sizes = [4, 16], strides = [1, 1]} : vector<64x16xf32> to vector<4x16xf32>
    %c280 = arith.constant 280 : index
    %c0_13 = arith.constant 0 : index
    %24 = vector.load %arg6[%c280, %c0_13] : memref<448x16xf32, #tpu.memory_space<vmem>>, vector<4x16xf32>
    tpu.vector_store %arg6[%c280, %c0_13], %23 {strides = array<i32>} : memref<448x16xf32, #tpu.memory_space<vmem>>, vector<4x16xf32>,
    %25 = vector.extract_strided_slice %2 {offsets = [44, 0], sizes = [4, 16], strides = [1, 1]} : vector<64x16xf32> to vector<4x16xf32>
    %c308 = arith.constant 308 : index
    %c0_14 = arith.constant 0 : index
    %26 = vector.load %arg6[%c308, %c0_14] : memref<448x16xf32, #tpu.memory_space<vmem>>, vector<4x16xf32>
    tpu.vector_store %arg6[%c308, %c0_14], %25 {strides = array<i32>} : memref<448x16xf32, #tpu.memory_space<vmem>>, vector<4x16xf32>,
    %27 = vector.extract_strided_slice %2 {offsets = [48, 0], sizes = [4, 16], strides = [1, 1]} : vector<64x16xf32> to vector<4x16xf32>
    %c336 = arith.constant 336 : index
    %c0_15 = arith.constant 0 : index
    %28 = vector.load %arg6[%c336, %c0_15] : memref<448x16xf32, #tpu.memory_space<vmem>>, vector<4x16xf32>
    tpu.vector_store %arg6[%c336, %c0_15], %27 {strides = array<i32>} : memref<448x16xf32, #tpu.memory_space<vmem>>, vector<4x16xf32>,
    %29 = vector.extract_strided_slice %2 {offsets = [52, 0], sizes = [4, 16], strides = [1, 1]} : vector<64x16xf32> to vector<4x16xf32>
    %c364 = arith.constant 364 : index
    %c0_16 = arith.constant 0 : index
    %30 = vector.load %arg6[%c364, %c0_16] : memref<448x16xf32, #tpu.memory_space<vmem>>, vector<4x16xf32>
    tpu.vector_store %arg6[%c364, %c0_16], %29 {strides = array<i32>} : memref<448x16xf32, #tpu.memory_space<vmem>>, vector<4x16xf32>,
    %31 = vector.extract_strided_slice %2 {offsets = [56, 0], sizes = [4, 16], strides = [1, 1]} : vector<64x16xf32> to vector<4x16xf32>
    %c392 = arith.constant 392 : index
    %c0_17 = arith.constant 0 : index
    %32 = vector.load %arg6[%c392, %c0_17] : memref<448x16xf32, #tpu.memory_space<vmem>>, vector<4x16xf32>
    tpu.vector_store %arg6[%c392, %c0_17], %31 {strides = array<i32>} : memref<448x16xf32, #tpu.memory_space<vmem>>, vector<4x16xf32>,
    %33 = vector.extract_strided_slice %2 {offsets = [60, 0], sizes = [4, 16], strides = [1, 1]} : vector<64x16xf32> to vector<4x16xf32>
    %c420 = arith.constant 420 : index
    %c0_18 = arith.constant 0 : index
    %34 = vector.load %arg6[%c420, %c0_18] : memref<448x16xf32, #tpu.memory_space<vmem>>, vector<4x16xf32>
    tpu.vector_store %arg6[%c420, %c0_18], %33 {strides = array<i32>} : memref<448x16xf32, #tpu.memory_space<vmem>>, vector<4x16xf32>,
    %c0_19 = arith.constant 0 : index
    %c0_20 = arith.constant 0 : index
    %c0_21 = arith.constant 0 : index
    %35 = vector.load %arg2[%c0_19, %c0_20, %c0_21] : memref<3x16x16xbf16, #tpu.memory_space<vmem>>, vector<1x16x16xbf16>
    %36 = vector.shape_cast %35 : vector<1x16x16xbf16> to vector<16x16xbf16>
    %cst = arith.constant dense<0.000000e+00> : vector<64x16xf32>
    %37 = tpu.matmul %1, %36, %cst {dimension_numbers = #tpu.dot_dimension_numbers<[1], [0], [0], [1], [0, 0, 1, 1], [], []>} : vector<64x16xbf16>, vector<16x16xbf16>, vector<64x16xf32> -> vector<64x16xf32>
    %38 = vector.extract_strided_slice %37 {offsets = [0, 0], sizes = [4, 16], strides = [1, 1]} : vector<64x16xf32> to vector<4x16xf32>
    %c4 = arith.constant 4 : index
    %c0_22 = arith.constant 0 : index
    %39 = vector.load %arg6[%c4, %c0_22] : memref<448x16xf32, #tpu.memory_space<vmem>>, vector<4x16xf32>
    tpu.vector_store %arg6[%c4, %c0_22], %38 {strides = array<i32>} : memref<448x16xf32, #tpu.memory_space<vmem>>, vector<4x16xf32>,
    %40 = vector.extract_strided_slice %37 {offsets = [4, 0], sizes = [4, 16], strides = [1, 1]} : vector<64x16xf32> to vector<4x16xf32>
    %c32 = arith.constant 32 : index
    %c0_23 = arith.constant 0 : index
    %41 = vector.load %arg6[%c32, %c0_23] : memref<448x16xf32, #tpu.memory_space<vmem>>, vector<4x16xf32>
    tpu.vector_store %arg6[%c32, %c0_23], %40 {strides = array<i32>} : memref<448x16xf32, #tpu.memory_space<vmem>>, vector<4x16xf32>,
    %42 = vector.extract_strided_slice %37 {offsets = [8, 0], sizes = [4, 16], strides = [1, 1]} : vector<64x16xf32> to vector<4x16xf32>
    %c60 = arith.constant 60 : index
    %c0_24 = arith.constant 0 : index
    %43 = vector.load %arg6[%c60, %c0_24] : memref<448x16xf32, #tpu.memory_space<vmem>>, vector<4x16xf32>
    tpu.vector_store %arg6[%c60, %c0_24], %42 {strides = array<i32>} : memref<448x16xf32, #tpu.memory_space<vmem>>, vector<4x16xf32>,
    %44 = vector.extract_strided_slice %37 {offsets = [12, 0], sizes = [4, 16], strides = [1, 1]} : vector<64x16xf32> to vector<4x16xf32>
    %c88 = arith.constant 88 : index
    %c0_25 = arith.constant 0 : index
    %45 = vector.load %arg6[%c88, %c0_25] : memref<448x16xf32, #tpu.memory_space<vmem>>, vector<4x16xf32>
    tpu.vector_store %arg6[%c88, %c0_25], %44 {strides = array<i32>} : memref<448x16xf32, #tpu.memory_space<vmem>>, vector<4x16xf32>,
    %46 = vector.extract_strided_slice %37 {offsets = [16, 0], sizes = [4, 16], strides = [1, 1]} : vector<64x16xf32> to vector<4x16xf32>
    %c116 = arith.constant 116 : index
    %c0_26 = arith.constant 0 : index
    %47 = vector.load %arg6[%c116, %c0_26] : memref<448x16xf32, #tpu.memory_space<vmem>>, vector<4x16xf32>
    tpu.vector_store %arg6[%c116, %c0_26], %46 {strides = array<i32>} : memref<448x16xf32, #tpu.memory_space<vmem>>, vector<4x16xf32>,
    %48 = vector.extract_strided_slice %37 {offsets = [20, 0], sizes = [4, 16], strides = [1, 1]} : vector<64x16xf32> to vector<4x16xf32>
    %c144 = arith.constant 144 : index
    %c0_27 = arith.constant 0 : index
    %49 = vector.load %arg6[%c144, %c0_27] : memref<448x16xf32, #tpu.memory_space<vmem>>, vector<4x16xf32>
    tpu.vector_store %arg6[%c144, %c0_27], %48 {strides = array<i32>} : memref<448x16xf32, #tpu.memory_space<vmem>>, vector<4x16xf32>,
    %50 = vector.extract_strided_slice %37 {offsets = [24, 0], sizes = [4, 16], strides = [1, 1]} : vector<64x16xf32> to vector<4x16xf32>
    %c172 = arith.constant 172 : index
    %c0_28 = arith.constant 0 : index
    %51 = vector.load %arg6[%c172, %c0_28] : memref<448x16xf32, #tpu.memory_space<vmem>>, vector<4x16xf32>
    tpu.vector_store %arg6[%c172, %c0_28], %50 {strides = array<i32>} : memref<448x16xf32, #tpu.memory_space<vmem>>, vector<4x16xf32>,
    %52 = vector.extract_strided_slice %37 {offsets = [28, 0], sizes = [4, 16], strides = [1, 1]} : vector<64x16xf32> to vector<4x16xf32>
    %c200 = arith.constant 200 : index
    %c0_29 = arith.constant 0 : index
    %53 = vector.load %arg6[%c200, %c0_29] : memref<448x16xf32, #tpu.memory_space<vmem>>, vector<4x16xf32>
    tpu.vector_store %arg6[%c200, %c0_29], %52 {strides = array<i32>} : memref<448x16xf32, #tpu.memory_space<vmem>>, vector<4x16xf32>,
    %54 = vector.extract_strided_slice %37 {offsets = [32, 0], sizes = [4, 16], strides = [1, 1]} : vector<64x16xf32> to vector<4x16xf32>
    %c228 = arith.constant 228 : index
    %c0_30 = arith.constant 0 : index
    %55 = vector.load %arg6[%c228, %c0_30] : memref<448x16xf32, #tpu.memory_space<vmem>>, vector<4x16xf32>
    tpu.vector_store %arg6[%c228, %c0_30], %54 {strides = array<i32>} : memref<448x16xf32, #tpu.memory_space<vmem>>, vector<4x16xf32>,
    %56 = vector.extract_strided_slice %37 {offsets = [36, 0], sizes = [4, 16], strides = [1, 1]} : vector<64x16xf32> to vector<4x16xf32>
    %c256 = arith.constant 256 : index
    %c0_31 = arith.constant 0 : index
    %57 = vector.load %arg6[%c256, %c0_31] : memref<448x16xf32, #tpu.memory_space<vmem>>, vector<4x16xf32>
    tpu.vector_store %arg6[%c256, %c0_31], %56 {strides = array<i32>} : memref<448x16xf32, #tpu.memory_space<vmem>>, vector<4x16xf32>,
    %58 = vector.extract_strided_slice %37 {offsets = [40, 0], sizes = [4, 16], strides = [1, 1]} : vector<64x16xf32> to vector<4x16xf32>
    %c284 = arith.constant 284 : index
    %c0_32 = arith.constant 0 : index
    %59 = vector.load %arg6[%c284, %c0_32] : memref<448x16xf32, #tpu.memory_space<vmem>>, vector<4x16xf32>
    tpu.vector_store %arg6[%c284, %c0_32], %58 {strides = array<i32>} : memref<448x16xf32, #tpu.memory_space<vmem>>, vector<4x16xf32>,
    %60 = vector.extract_strided_slice %37 {offsets = [44, 0], sizes = [4, 16], strides = [1, 1]} : vector<64x16xf32> to vector<4x16xf32>
    %c312 = arith.constant 312 : index
    %c0_33 = arith.constant 0 : index
    %61 = vector.load %arg6[%c312, %c0_33] : memref<448x16xf32, #tpu.memory_space<vmem>>, vector<4x16xf32>
    tpu.vector_store %arg6[%c312, %c0_33], %60 {strides = array<i32>} : memref<448x16xf32, #tpu.memory_space<vmem>>, vector<4x16xf32>,
    %62 = vector.extract_strided_slice %37 {offsets = [48, 0], sizes = [4, 16], strides = [1, 1]} : vector<64x16xf32> to vector<4x16xf32>
    %c340 = arith.constant 340 : index
    %c0_34 = arith.constant 0 : index
    %63 = vector.load %arg6[%c340, %c0_34] : memref<448x16xf32, #tpu.memory_space<vmem>>, vector<4x16xf32>
    tpu.vector_store %arg6[%c340, %c0_34], %62 {strides = array<i32>} : memref<448x16xf32, #tpu.memory_space<vmem>>, vector<4x16xf32>,
    %64 = vector.extract_strided_slice %37 {offsets = [52, 0], sizes = [4, 16], strides = [1, 1]} : vector<64x16xf32> to vector<4x16xf32>
    %c368 = arith.constant 368 : index
    %c0_35 = arith.constant 0 : index
    %65 = vector.load %arg6[%c368, %c0_35] : memref<448x16xf32, #tpu.memory_space<vmem>>, vector<4x16xf32>
    tpu.vector_store %arg6[%c368, %c0_35], %64 {strides = array<i32>} : memref<448x16xf32, #tpu.memory_space<vmem>>, vector<4x16xf32>,
    %66 = vector.extract_strided_slice %37 {offsets = [56, 0], sizes = [4, 16], strides = [1, 1]} : vector<64x16xf32> to vector<4x16xf32>
    %c396 = arith.constant 396 : index
    %c0_36 = arith.constant 0 : index
    %67 = vector.load %arg6[%c396, %c0_36] : memref<448x16xf32, #tpu.memory_space<vmem>>, vector<4x16xf32>
    tpu.vector_store %arg6[%c396, %c0_36], %66 {strides = array<i32>} : memref<448x16xf32, #tpu.memory_space<vmem>>, vector<4x16xf32>,
    %68 = vector.extract_strided_slice %37 {offsets = [60, 0], sizes = [4, 16], strides = [1, 1]} : vector<64x16xf32> to vector<4x16xf32>
    %c424 = arith.constant 424 : index
    %c0_37 = arith.constant 0 : index
    %69 = vector.load %arg6[%c424, %c0_37] : memref<448x16xf32, #tpu.memory_space<vmem>>, vector<4x16xf32>
    tpu.vector_store %arg6[%c424, %c0_37], %68 {strides = array<i32>} : memref<448x16xf32, #tpu.memory_space<vmem>>, vector<4x16xf32>,
    %70 = arith.truncf %37 : vector<64x16xf32> to vector<64x16xbf16>
    %cst_38 = arith.constant dense<0.000000e+00> : vector<64x16xf32>
    %71 = tpu.matmul %70, %36, %cst_38 {dimension_numbers = #tpu.dot_dimension_numbers<[1], [0], [0], [1], [0, 0, 1, 1], [], []>} : vector<64x16xbf16>, vector<16x16xbf16>, vector<64x16xf32> -> vector<64x16xf32>
    %72 = vector.extract_strided_slice %71 {offsets = [0, 0], sizes = [4, 16], strides = [1, 1]} : vector<64x16xf32> to vector<4x16xf32>
    %c8 = arith.constant 8 : index
    %c0_39 = arith.constant 0 : index
    %73 = vector.load %arg6[%c8, %c0_39] : memref<448x16xf32, #tpu.memory_space<vmem>>, vector<4x16xf32>
    tpu.vector_store %arg6[%c8, %c0_39], %72 {strides = array<i32>} : memref<448x16xf32, #tpu.memory_space<vmem>>, vector<4x16xf32>,
    %74 = vector.extract_strided_slice %71 {offsets = [4, 0], sizes = [4, 16], strides = [1, 1]} : vector<64x16xf32> to vector<4x16xf32>
    %c36 = arith.constant 36 : index
    %c0_40 = arith.constant 0 : index
    %75 = vector.load %arg6[%c36, %c0_40] : memref<448x16xf32, #tpu.memory_space<vmem>>, vector<4x16xf32>
    tpu.vector_store %arg6[%c36, %c0_40], %74 {strides = array<i32>} : memref<448x16xf32, #tpu.memory_space<vmem>>, vector<4x16xf32>,
    %76 = vector.extract_strided_slice %71 {offsets = [8, 0], sizes = [4, 16], strides = [1, 1]} : vector<64x16xf32> to vector<4x16xf32>
    %c64 = arith.constant 64 : index
    %c0_41 = arith.constant 0 : index
    %77 = vector.load %arg6[%c64, %c0_41] : memref<448x16xf32, #tpu.memory_space<vmem>>, vector<4x16xf32>
    tpu.vector_store %arg6[%c64, %c0_41], %76 {strides = array<i32>} : memref<448x16xf32, #tpu.memory_space<vmem>>, vector<4x16xf32>,
    %78 = vector.extract_strided_slice %71 {offsets = [12, 0], sizes = [4, 16], strides = [1, 1]} : vector<64x16xf32> to vector<4x16xf32>
    %c92 = arith.constant 92 : index
    %c0_42 = arith.constant 0 : index
    %79 = vector.load %arg6[%c92, %c0_42] : memref<448x16xf32, #tpu.memory_space<vmem>>, vector<4x16xf32>
    tpu.vector_store %arg6[%c92, %c0_42], %78 {strides = array<i32>} : memref<448x16xf32, #tpu.memory_space<vmem>>, vector<4x16xf32>,
    %80 = vector.extract_strided_slice %71 {offsets = [16, 0], sizes = [4, 16], strides = [1, 1]} : vector<64x16xf32> to vector<4x16xf32>
    %c120 = arith.constant 120 : index
    %c0_43 = arith.constant 0 : index
    %81 = vector.load %arg6[%c120, %c0_43] : memref<448x16xf32, #tpu.memory_space<vmem>>, vector<4x16xf32>
    tpu.vector_store %arg6[%c120, %c0_43], %80 {strides = array<i32>} : memref<448x16xf32, #tpu.memory_space<vmem>>, vector<4x16xf32>,
    %82 = vector.extract_strided_slice %71 {offsets = [20, 0], sizes = [4, 16], strides = [1, 1]} : vector<64x16xf32> to vector<4x16xf32>
    %c148 = arith.constant 148 : index
    %c0_44 = arith.constant 0 : index
    %83 = vector.load %arg6[%c148, %c0_44] : memref<448x16xf32, #tpu.memory_space<vmem>>, vector<4x16xf32>
    tpu.vector_store %arg6[%c148, %c0_44], %82 {strides = array<i32>} : memref<448x16xf32, #tpu.memory_space<vmem>>, vector<4x16xf32>,
    %84 = vector.extract_strided_slice %71 {offsets = [24, 0], sizes = [4, 16], strides = [1, 1]} : vector<64x16xf32> to vector<4x16xf32>
    %c176 = arith.constant 176 : index
    %c0_45 = arith.constant 0 : index
    %85 = vector.load %arg6[%c176, %c0_45] : memref<448x16xf32, #tpu.memory_space<vmem>>, vector<4x16xf32>
    tpu.vector_store %arg6[%c176, %c0_45], %84 {strides = array<i32>} : memref<448x16xf32, #tpu.memory_space<vmem>>, vector<4x16xf32>,
    %86 = vector.extract_strided_slice %71 {offsets = [28, 0], sizes = [4, 16], strides = [1, 1]} : vector<64x16xf32> to vector<4x16xf32>
    %c204 = arith.constant 204 : index
    %c0_46 = arith.constant 0 : index
    %87 = vector.load %arg6[%c204, %c0_46] : memref<448x16xf32, #tpu.memory_space<vmem>>, vector<4x16xf32>
    tpu.vector_store %arg6[%c204, %c0_46], %86 {strides = array<i32>} : memref<448x16xf32, #tpu.memory_space<vmem>>, vector<4x16xf32>,
    %88 = vector.extract_strided_slice %71 {offsets = [32, 0], sizes = [4, 16], strides = [1, 1]} : vector<64x16xf32> to vector<4x16xf32>
    %c232 = arith.constant 232 : index
    %c0_47 = arith.constant 0 : index
    %89 = vector.load %arg6[%c232, %c0_47] : memref<448x16xf32, #tpu.memory_space<vmem>>, vector<4x16xf32>
    tpu.vector_store %arg6[%c232, %c0_47], %88 {strides = array<i32>} : memref<448x16xf32, #tpu.memory_space<vmem>>, vector<4x16xf32>,
    %90 = vector.extract_strided_slice %71 {offsets = [36, 0], sizes = [4, 16], strides = [1, 1]} : vector<64x16xf32> to vector<4x16xf32>
    %c260 = arith.constant 260 : index
    %c0_48 = arith.constant 0 : index
    %91 = vector.load %arg6[%c260, %c0_48] : memref<448x16xf32, #tpu.memory_space<vmem>>, vector<4x16xf32>
    tpu.vector_store %arg6[%c260, %c0_48], %90 {strides = array<i32>} : memref<448x16xf32, #tpu.memory_space<vmem>>, vector<4x16xf32>,
    %92 = vector.extract_strided_slice %71 {offsets = [40, 0], sizes = [4, 16], strides = [1, 1]} : vector<64x16xf32> to vector<4x16xf32>
    %c288 = arith.constant 288 : index
    %c0_49 = arith.constant 0 : index
    %93 = vector.load %arg6[%c288, %c0_49] : memref<448x16xf32, #tpu.memory_space<vmem>>, vector<4x16xf32>
    tpu.vector_store %arg6[%c288, %c0_49], %92 {strides = array<i32>} : memref<448x16xf32, #tpu.memory_space<vmem>>, vector<4x16xf32>,
    %94 = vector.extract_strided_slice %71 {offsets = [44, 0], sizes = [4, 16], strides = [1, 1]} : vector<64x16xf32> to vector<4x16xf32>
    %c316 = arith.constant 316 : index
    %c0_50 = arith.constant 0 : index
    %95 = vector.load %arg6[%c316, %c0_50] : memref<448x16xf32, #tpu.memory_space<vmem>>, vector<4x16xf32>
    tpu.vector_store %arg6[%c316, %c0_50], %94 {strides = array<i32>} : memref<448x16xf32, #tpu.memory_space<vmem>>, vector<4x16xf32>,
    %96 = vector.extract_strided_slice %71 {offsets = [48, 0], sizes = [4, 16], strides = [1, 1]} : vector<64x16xf32> to vector<4x16xf32>
    %c344 = arith.constant 344 : index
    %c0_51 = arith.constant 0 : index
    %97 = vector.load %arg6[%c344, %c0_51] : memref<448x16xf32, #tpu.memory_space<vmem>>, vector<4x16xf32>
    tpu.vector_store %arg6[%c344, %c0_51], %96 {strides = array<i32>} : memref<448x16xf32, #tpu.memory_space<vmem>>, vector<4x16xf32>,
    %98 = vector.extract_strided_slice %71 {offsets = [52, 0], sizes = [4, 16], strides = [1, 1]} : vector<64x16xf32> to vector<4x16xf32>
    %c372 = arith.constant 372 : index
    %c0_52 = arith.constant 0 : index
    %99 = vector.load %arg6[%c372, %c0_52] : memref<448x16xf32, #tpu.memory_space<vmem>>, vector<4x16xf32>
    tpu.vector_store %arg6[%c372, %c0_52], %98 {strides = array<i32>} : memref<448x16xf32, #tpu.memory_space<vmem>>, vector<4x16xf32>,
    %100 = vector.extract_strided_slice %71 {offsets = [56, 0], sizes = [4, 16], strides = [1, 1]} : vector<64x16xf32> to vector<4x16xf32>
    %c400 = arith.constant 400 : index
    %c0_53 = arith.constant 0 : index
    %101 = vector.load %arg6[%c400, %c0_53] : memref<448x16xf32, #tpu.memory_space<vmem>>, vector<4x16xf32>
    tpu.vector_store %arg6[%c400, %c0_53], %100 {strides = array<i32>} : memref<448x16xf32, #tpu.memory_space<vmem>>, vector<4x16xf32>,
    %102 = vector.extract_strided_slice %71 {offsets = [60, 0], sizes = [4, 16], strides = [1, 1]} : vector<64x16xf32> to vector<4x16xf32>
    %c428 = arith.constant 428 : index
    %c0_54 = arith.constant 0 : index
    %103 = vector.load %arg6[%c428, %c0_54] : memref<448x16xf32, #tpu.memory_space<vmem>>, vector<4x16xf32>
    tpu.vector_store %arg6[%c428, %c0_54], %102 {strides = array<i32>} : memref<448x16xf32, #tpu.memory_space<vmem>>, vector<4x16xf32>,
    %c1 = arith.constant 1 : index
    %c0_55 = arith.constant 0 : index
    %c0_56 = arith.constant 0 : index
    %104 = vector.load %arg2[%c1, %c0_55, %c0_56] : memref<3x16x16xbf16, #tpu.memory_space<vmem>>, vector<1x16x16xbf16>
    %105 = vector.shape_cast %104 : vector<1x16x16xbf16> to vector<16x16xbf16>
    %cst_57 = arith.constant dense<0.000000e+00> : vector<64x16xf32>
    %106 = tpu.matmul %1, %105, %cst_57 {dimension_numbers = #tpu.dot_dimension_numbers<[1], [0], [0], [1], [0, 0, 1, 1], [], []>} : vector<64x16xbf16>, vector<16x16xbf16>, vector<64x16xf32> -> vector<64x16xf32>
    %107 = vector.extract_strided_slice %106 {offsets = [0, 0], sizes = [4, 16], strides = [1, 1]} : vector<64x16xf32> to vector<4x16xf32>
    %c12 = arith.constant 12 : index
    %c0_58 = arith.constant 0 : index
    %108 = vector.load %arg6[%c12, %c0_58] : memref<448x16xf32, #tpu.memory_space<vmem>>, vector<4x16xf32>
    tpu.vector_store %arg6[%c12, %c0_58], %107 {strides = array<i32>} : memref<448x16xf32, #tpu.memory_space<vmem>>, vector<4x16xf32>,
    %109 = vector.extract_strided_slice %106 {offsets = [4, 0], sizes = [4, 16], strides = [1, 1]} : vector<64x16xf32> to vector<4x16xf32>
    %c40 = arith.constant 40 : index
    %c0_59 = arith.constant 0 : index
    %110 = vector.load %arg6[%c40, %c0_59] : memref<448x16xf32, #tpu.memory_space<vmem>>, vector<4x16xf32>
    tpu.vector_store %arg6[%c40, %c0_59], %109 {strides = array<i32>} : memref<448x16xf32, #tpu.memory_space<vmem>>, vector<4x16xf32>,
    %111 = vector.extract_strided_slice %106 {offsets = [8, 0], sizes = [4, 16], strides = [1, 1]} : vector<64x16xf32> to vector<4x16xf32>
    %c68 = arith.constant 68 : index
    %c0_60 = arith.constant 0 : index
    %112 = vector.load %arg6[%c68, %c0_60] : memref<448x16xf32, #tpu.memory_space<vmem>>, vector<4x16xf32>
    tpu.vector_store %arg6[%c68, %c0_60], %111 {strides = array<i32>} : memref<448x16xf32, #tpu.memory_space<vmem>>, vector<4x16xf32>,
    %113 = vector.extract_strided_slice %106 {offsets = [12, 0], sizes = [4, 16], strides = [1, 1]} : vector<64x16xf32> to vector<4x16xf32>
    %c96 = arith.constant 96 : index
    %c0_61 = arith.constant 0 : index
    %114 = vector.load %arg6[%c96, %c0_61] : memref<448x16xf32, #tpu.memory_space<vmem>>, vector<4x16xf32>
    tpu.vector_store %arg6[%c96, %c0_61], %113 {strides = array<i32>} : memref<448x16xf32, #tpu.memory_space<vmem>>, vector<4x16xf32>,
    %115 = vector.extract_strided_slice %106 {offsets = [16, 0], sizes = [4, 16], strides = [1, 1]} : vector<64x16xf32> to vector<4x16xf32>
    %c124 = arith.constant 124 : index
    %c0_62 = arith.constant 0 : index
    %116 = vector.load %arg6[%c124, %c0_62] : memref<448x16xf32, #tpu.memory_space<vmem>>, vector<4x16xf32>
    tpu.vector_store %arg6[%c124, %c0_62], %115 {strides = array<i32>} : memref<448x16xf32, #tpu.memory_space<vmem>>, vector<4x16xf32>,
    %117 = vector.extract_strided_slice %106 {offsets = [20, 0], sizes = [4, 16], strides = [1, 1]} : vector<64x16xf32> to vector<4x16xf32>
    %c152 = arith.constant 152 : index
    %c0_63 = arith.constant 0 : index
    %118 = vector.load %arg6[%c152, %c0_63] : memref<448x16xf32, #tpu.memory_space<vmem>>, vector<4x16xf32>
    tpu.vector_store %arg6[%c152, %c0_63], %117 {strides = array<i32>} : memref<448x16xf32, #tpu.memory_space<vmem>>, vector<4x16xf32>,
    %119 = vector.extract_strided_slice %106 {offsets = [24, 0], sizes = [4, 16], strides = [1, 1]} : vector<64x16xf32> to vector<4x16xf32>
    %c180 = arith.constant 180 : index
    %c0_64 = arith.constant 0 : index
    %120 = vector.load %arg6[%c180, %c0_64] : memref<448x16xf32, #tpu.memory_space<vmem>>, vector<4x16xf32>
    tpu.vector_store %arg6[%c180, %c0_64], %119 {strides = array<i32>} : memref<448x16xf32, #tpu.memory_space<vmem>>, vector<4x16xf32>,
    %121 = vector.extract_strided_slice %106 {offsets = [28, 0], sizes = [4, 16], strides = [1, 1]} : vector<64x16xf32> to vector<4x16xf32>
    %c208 = arith.constant 208 : index
    %c0_65 = arith.constant 0 : index
    %122 = vector.load %arg6[%c208, %c0_65] : memref<448x16xf32, #tpu.memory_space<vmem>>, vector<4x16xf32>
    tpu.vector_store %arg6[%c208, %c0_65], %121 {strides = array<i32>} : memref<448x16xf32, #tpu.memory_space<vmem>>, vector<4x16xf32>,
    %123 = vector.extract_strided_slice %106 {offsets = [32, 0], sizes = [4, 16], strides = [1, 1]} : vector<64x16xf32> to vector<4x16xf32>
    %c236 = arith.constant 236 : index
    %c0_66 = arith.constant 0 : index
    %124 = vector.load %arg6[%c236, %c0_66] : memref<448x16xf32, #tpu.memory_space<vmem>>, vector<4x16xf32>
    tpu.vector_store %arg6[%c236, %c0_66], %123 {strides = array<i32>} : memref<448x16xf32, #tpu.memory_space<vmem>>, vector<4x16xf32>,
    %125 = vector.extract_strided_slice %106 {offsets = [36, 0], sizes = [4, 16], strides = [1, 1]} : vector<64x16xf32> to vector<4x16xf32>
    %c264 = arith.constant 264 : index
    %c0_67 = arith.constant 0 : index
    %126 = vector.load %arg6[%c264, %c0_67] : memref<448x16xf32, #tpu.memory_space<vmem>>, vector<4x16xf32>
    tpu.vector_store %arg6[%c264, %c0_67], %125 {strides = array<i32>} : memref<448x16xf32, #tpu.memory_space<vmem>>, vector<4x16xf32>,
    %127 = vector.extract_strided_slice %106 {offsets = [40, 0], sizes = [4, 16], strides = [1, 1]} : vector<64x16xf32> to vector<4x16xf32>
    %c292 = arith.constant 292 : index
    %c0_68 = arith.constant 0 : index
    %128 = vector.load %arg6[%c292, %c0_68] : memref<448x16xf32, #tpu.memory_space<vmem>>, vector<4x16xf32>
    tpu.vector_store %arg6[%c292, %c0_68], %127 {strides = array<i32>} : memref<448x16xf32, #tpu.memory_space<vmem>>, vector<4x16xf32>,
    %129 = vector.extract_strided_slice %106 {offsets = [44, 0], sizes = [4, 16], strides = [1, 1]} : vector<64x16xf32> to vector<4x16xf32>
    %c320 = arith.constant 320 : index
    %c0_69 = arith.constant 0 : index
    %130 = vector.load %arg6[%c320, %c0_69] : memref<448x16xf32, #tpu.memory_space<vmem>>, vector<4x16xf32>
    tpu.vector_store %arg6[%c320, %c0_69], %129 {strides = array<i32>} : memref<448x16xf32, #tpu.memory_space<vmem>>, vector<4x16xf32>,
    %131 = vector.extract_strided_slice %106 {offsets = [48, 0], sizes = [4, 16], strides = [1, 1]} : vector<64x16xf32> to vector<4x16xf32>
    %c348 = arith.constant 348 : index
    %c0_70 = arith.constant 0 : index
    %132 = vector.load %arg6[%c348, %c0_70] : memref<448x16xf32, #tpu.memory_space<vmem>>, vector<4x16xf32>
    tpu.vector_store %arg6[%c348, %c0_70], %131 {strides = array<i32>} : memref<448x16xf32, #tpu.memory_space<vmem>>, vector<4x16xf32>,
    %133 = vector.extract_strided_slice %106 {offsets = [52, 0], sizes = [4, 16], strides = [1, 1]} : vector<64x16xf32> to vector<4x16xf32>
    %c376 = arith.constant 376 : index
    %c0_71 = arith.constant 0 : index
    %134 = vector.load %arg6[%c376, %c0_71] : memref<448x16xf32, #tpu.memory_space<vmem>>, vector<4x16xf32>
    tpu.vector_store %arg6[%c376, %c0_71], %133 {strides = array<i32>} : memref<448x16xf32, #tpu.memory_space<vmem>>, vector<4x16xf32>,
    %135 = vector.extract_strided_slice %106 {offsets = [56, 0], sizes = [4, 16], strides = [1, 1]} : vector<64x16xf32> to vector<4x16xf32>
    %c404 = arith.constant 404 : index
    %c0_72 = arith.constant 0 : index
    %136 = vector.load %arg6[%c404, %c0_72] : memref<448x16xf32, #tpu.memory_space<vmem>>, vector<4x16xf32>
    tpu.vector_store %arg6[%c404, %c0_72], %135 {strides = array<i32>} : memref<448x16xf32, #tpu.memory_space<vmem>>, vector<4x16xf32>,
    %137 = vector.extract_strided_slice %106 {offsets = [60, 0], sizes = [4, 16], strides = [1, 1]} : vector<64x16xf32> to vector<4x16xf32>
    %c432 = arith.constant 432 : index
    %c0_73 = arith.constant 0 : index
    %138 = vector.load %arg6[%c432, %c0_73] : memref<448x16xf32, #tpu.memory_space<vmem>>, vector<4x16xf32>
    tpu.vector_store %arg6[%c432, %c0_73], %137 {strides = array<i32>} : memref<448x16xf32, #tpu.memory_space<vmem>>, vector<4x16xf32>,
    %139 = arith.truncf %106 : vector<64x16xf32> to vector<64x16xbf16>
    %cst_74 = arith.constant dense<0.000000e+00> : vector<64x16xf32>
    %140 = tpu.matmul %139, %105, %cst_74 {dimension_numbers = #tpu.dot_dimension_numbers<[1], [0], [0], [1], [0, 0, 1, 1], [], []>} : vector<64x16xbf16>, vector<16x16xbf16>, vector<64x16xf32> -> vector<64x16xf32>
    %141 = vector.extract_strided_slice %140 {offsets = [0, 0], sizes = [4, 16], strides = [1, 1]} : vector<64x16xf32> to vector<4x16xf32>
    %c16 = arith.constant 16 : index
    %c0_75 = arith.constant 0 : index
    %142 = vector.load %arg6[%c16, %c0_75] : memref<448x16xf32, #tpu.memory_space<vmem>>, vector<4x16xf32>
    tpu.vector_store %arg6[%c16, %c0_75], %141 {strides = array<i32>} : memref<448x16xf32, #tpu.memory_space<vmem>>, vector<4x16xf32>,
    %143 = vector.extract_strided_slice %140 {offsets = [4, 0], sizes = [4, 16], strides = [1, 1]} : vector<64x16xf32> to vector<4x16xf32>
    %c44 = arith.constant 44 : index
    %c0_76 = arith.constant 0 : index
    %144 = vector.load %arg6[%c44, %c0_76] : memref<448x16xf32, #tpu.memory_space<vmem>>, vector<4x16xf32>
    tpu.vector_store %arg6[%c44, %c0_76], %143 {strides = array<i32>} : memref<448x16xf32, #tpu.memory_space<vmem>>, vector<4x16xf32>,
    %145 = vector.extract_strided_slice %140 {offsets = [8, 0], sizes = [4, 16], strides = [1, 1]} : vector<64x16xf32> to vector<4x16xf32>
    %c72 = arith.constant 72 : index
    %c0_77 = arith.constant 0 : index
    %146 = vector.load %arg6[%c72, %c0_77] : memref<448x16xf32, #tpu.memory_space<vmem>>, vector<4x16xf32>
    tpu.vector_store %arg6[%c72, %c0_77], %145 {strides = array<i32>} : memref<448x16xf32, #tpu.memory_space<vmem>>, vector<4x16xf32>,
    %147 = vector.extract_strided_slice %140 {offsets = [12, 0], sizes = [4, 16], strides = [1, 1]} : vector<64x16xf32> to vector<4x16xf32>
    %c100 = arith.constant 100 : index
    %c0_78 = arith.constant 0 : index
    %148 = vector.load %arg6[%c100, %c0_78] : memref<448x16xf32, #tpu.memory_space<vmem>>, vector<4x16xf32>
    tpu.vector_store %arg6[%c100, %c0_78], %147 {strides = array<i32>} : memref<448x16xf32, #tpu.memory_space<vmem>>, vector<4x16xf32>,
    %149 = vector.extract_strided_slice %140 {offsets = [16, 0], sizes = [4, 16], strides = [1, 1]} : vector<64x16xf32> to vector<4x16xf32>
    %c128 = arith.constant 128 : index
    %c0_79 = arith.constant 0 : index
    %150 = vector.load %arg6[%c128, %c0_79] : memref<448x16xf32, #tpu.memory_space<vmem>>, vector<4x16xf32>
    tpu.vector_store %arg6[%c128, %c0_79], %149 {strides = array<i32>} : memref<448x16xf32, #tpu.memory_space<vmem>>, vector<4x16xf32>,
    %151 = vector.extract_strided_slice %140 {offsets = [20, 0], sizes = [4, 16], strides = [1, 1]} : vector<64x16xf32> to vector<4x16xf32>
    %c156 = arith.constant 156 : index
    %c0_80 = arith.constant 0 : index
    %152 = vector.load %arg6[%c156, %c0_80] : memref<448x16xf32, #tpu.memory_space<vmem>>, vector<4x16xf32>
    tpu.vector_store %arg6[%c156, %c0_80], %151 {strides = array<i32>} : memref<448x16xf32, #tpu.memory_space<vmem>>, vector<4x16xf32>,
    %153 = vector.extract_strided_slice %140 {offsets = [24, 0], sizes = [4, 16], strides = [1, 1]} : vector<64x16xf32> to vector<4x16xf32>
    %c184 = arith.constant 184 : index
    %c0_81 = arith.constant 0 : index
    %154 = vector.load %arg6[%c184, %c0_81] : memref<448x16xf32, #tpu.memory_space<vmem>>, vector<4x16xf32>
    tpu.vector_store %arg6[%c184, %c0_81], %153 {strides = array<i32>} : memref<448x16xf32, #tpu.memory_space<vmem>>, vector<4x16xf32>,
    %155 = vector.extract_strided_slice %140 {offsets = [28, 0], sizes = [4, 16], strides = [1, 1]} : vector<64x16xf32> to vector<4x16xf32>
    %c212 = arith.constant 212 : index
    %c0_82 = arith.constant 0 : index
    %156 = vector.load %arg6[%c212, %c0_82] : memref<448x16xf32, #tpu.memory_space<vmem>>, vector<4x16xf32>
    tpu.vector_store %arg6[%c212, %c0_82], %155 {strides = array<i32>} : memref<448x16xf32, #tpu.memory_space<vmem>>, vector<4x16xf32>,
    %157 = vector.extract_strided_slice %140 {offsets = [32, 0], sizes = [4, 16], strides = [1, 1]} : vector<64x16xf32> to vector<4x16xf32>
    %c240 = arith.constant 240 : index
    %c0_83 = arith.constant 0 : index
    %158 = vector.load %arg6[%c240, %c0_83] : memref<448x16xf32, #tpu.memory_space<vmem>>, vector<4x16xf32>
    tpu.vector_store %arg6[%c240, %c0_83], %157 {strides = array<i32>} : memref<448x16xf32, #tpu.memory_space<vmem>>, vector<4x16xf32>,
    %159 = vector.extract_strided_slice %140 {offsets = [36, 0], sizes = [4, 16], strides = [1, 1]} : vector<64x16xf32> to vector<4x16xf32>
    %c268 = arith.constant 268 : index
    %c0_84 = arith.constant 0 : index
    %160 = vector.load %arg6[%c268, %c0_84] : memref<448x16xf32, #tpu.memory_space<vmem>>, vector<4x16xf32>
    tpu.vector_store %arg6[%c268, %c0_84], %159 {strides = array<i32>} : memref<448x16xf32, #tpu.memory_space<vmem>>, vector<4x16xf32>,
    %161 = vector.extract_strided_slice %140 {offsets = [40, 0], sizes = [4, 16], strides = [1, 1]} : vector<64x16xf32> to vector<4x16xf32>
    %c296 = arith.constant 296 : index
    %c0_85 = arith.constant 0 : index
    %162 = vector.load %arg6[%c296, %c0_85] : memref<448x16xf32, #tpu.memory_space<vmem>>, vector<4x16xf32>
    tpu.vector_store %arg6[%c296, %c0_85], %161 {strides = array<i32>} : memref<448x16xf32, #tpu.memory_space<vmem>>, vector<4x16xf32>,
    %163 = vector.extract_strided_slice %140 {offsets = [44, 0], sizes = [4, 16], strides = [1, 1]} : vector<64x16xf32> to vector<4x16xf32>
    %c324 = arith.constant 324 : index
    %c0_86 = arith.constant 0 : index
    %164 = vector.load %arg6[%c324, %c0_86] : memref<448x16xf32, #tpu.memory_space<vmem>>, vector<4x16xf32>
    tpu.vector_store %arg6[%c324, %c0_86], %163 {strides = array<i32>} : memref<448x16xf32, #tpu.memory_space<vmem>>, vector<4x16xf32>,
    %165 = vector.extract_strided_slice %140 {offsets = [48, 0], sizes = [4, 16], strides = [1, 1]} : vector<64x16xf32> to vector<4x16xf32>
    %c352 = arith.constant 352 : index
    %c0_87 = arith.constant 0 : index
    %166 = vector.load %arg6[%c352, %c0_87] : memref<448x16xf32, #tpu.memory_space<vmem>>, vector<4x16xf32>
    tpu.vector_store %arg6[%c352, %c0_87], %165 {strides = array<i32>} : memref<448x16xf32, #tpu.memory_space<vmem>>, vector<4x16xf32>,
    %167 = vector.extract_strided_slice %140 {offsets = [52, 0], sizes = [4, 16], strides = [1, 1]} : vector<64x16xf32> to vector<4x16xf32>
    %c380 = arith.constant 380 : index
    %c0_88 = arith.constant 0 : index
    %168 = vector.load %arg6[%c380, %c0_88] : memref<448x16xf32, #tpu.memory_space<vmem>>, vector<4x16xf32>
    tpu.vector_store %arg6[%c380, %c0_88], %167 {strides = array<i32>} : memref<448x16xf32, #tpu.memory_space<vmem>>, vector<4x16xf32>,
    %169 = vector.extract_strided_slice %140 {offsets = [56, 0], sizes = [4, 16], strides = [1, 1]} : vector<64x16xf32> to vector<4x16xf32>
    %c408 = arith.constant 408 : index
    %c0_89 = arith.constant 0 : index
    %170 = vector.load %arg6[%c408, %c0_89] : memref<448x16xf32, #tpu.memory_space<vmem>>, vector<4x16xf32>
    tpu.vector_store %arg6[%c408, %c0_89], %169 {strides = array<i32>} : memref<448x16xf32, #tpu.memory_space<vmem>>, vector<4x16xf32>,
    %171 = vector.extract_strided_slice %140 {offsets = [60, 0], sizes = [4, 16], strides = [1, 1]} : vector<64x16xf32> to vector<4x16xf32>
    %c436 = arith.constant 436 : index
    %c0_90 = arith.constant 0 : index
    %172 = vector.load %arg6[%c436, %c0_90] : memref<448x16xf32, #tpu.memory_space<vmem>>, vector<4x16xf32>
    tpu.vector_store %arg6[%c436, %c0_90], %171 {strides = array<i32>} : memref<448x16xf32, #tpu.memory_space<vmem>>, vector<4x16xf32>,
    %c2 = arith.constant 2 : index
    %c0_91 = arith.constant 0 : index
    %c0_92 = arith.constant 0 : index
    %173 = vector.load %arg2[%c2, %c0_91, %c0_92] : memref<3x16x16xbf16, #tpu.memory_space<vmem>>, vector<1x16x16xbf16>
    %174 = vector.shape_cast %173 : vector<1x16x16xbf16> to vector<16x16xbf16>
    %cst_93 = arith.constant dense<0.000000e+00> : vector<64x16xf32>
    %175 = tpu.matmul %1, %174, %cst_93 {dimension_numbers = #tpu.dot_dimension_numbers<[1], [0], [0], [1], [0, 0, 1, 1], [], []>} : vector<64x16xbf16>, vector<16x16xbf16>, vector<64x16xf32> -> vector<64x16xf32>
    %176 = vector.extract_strided_slice %175 {offsets = [0, 0], sizes = [4, 16], strides = [1, 1]} : vector<64x16xf32> to vector<4x16xf32>
    %c20 = arith.constant 20 : index
    %c0_94 = arith.constant 0 : index
    %177 = vector.load %arg6[%c20, %c0_94] : memref<448x16xf32, #tpu.memory_space<vmem>>, vector<4x16xf32>
    tpu.vector_store %arg6[%c20, %c0_94], %176 {strides = array<i32>} : memref<448x16xf32, #tpu.memory_space<vmem>>, vector<4x16xf32>,
    %178 = vector.extract_strided_slice %175 {offsets = [4, 0], sizes = [4, 16], strides = [1, 1]} : vector<64x16xf32> to vector<4x16xf32>
    %c48 = arith.constant 48 : index
    %c0_95 = arith.constant 0 : index
    %179 = vector.load %arg6[%c48, %c0_95] : memref<448x16xf32, #tpu.memory_space<vmem>>, vector<4x16xf32>
    tpu.vector_store %arg6[%c48, %c0_95], %178 {strides = array<i32>} : memref<448x16xf32, #tpu.memory_space<vmem>>, vector<4x16xf32>,
    %180 = vector.extract_strided_slice %175 {offsets = [8, 0], sizes = [4, 16], strides = [1, 1]} : vector<64x16xf32> to vector<4x16xf32>
    %c76 = arith.constant 76 : index
    %c0_96 = arith.constant 0 : index
    %181 = vector.load %arg6[%c76, %c0_96] : memref<448x16xf32, #tpu.memory_space<vmem>>, vector<4x16xf32>
    tpu.vector_store %arg6[%c76, %c0_96], %180 {strides = array<i32>} : memref<448x16xf32, #tpu.memory_space<vmem>>, vector<4x16xf32>,
    %182 = vector.extract_strided_slice %175 {offsets = [12, 0], sizes = [4, 16], strides = [1, 1]} : vector<64x16xf32> to vector<4x16xf32>
    %c104 = arith.constant 104 : index
    %c0_97 = arith.constant 0 : index
    %183 = vector.load %arg6[%c104, %c0_97] : memref<448x16xf32, #tpu.memory_space<vmem>>, vector<4x16xf32>
    tpu.vector_store %arg6[%c104, %c0_97], %182 {strides = array<i32>} : memref<448x16xf32, #tpu.memory_space<vmem>>, vector<4x16xf32>,
    %184 = vector.extract_strided_slice %175 {offsets = [16, 0], sizes = [4, 16], strides = [1, 1]} : vector<64x16xf32> to vector<4x16xf32>
    %c132 = arith.constant 132 : index
    %c0_98 = arith.constant 0 : index
    %185 = vector.load %arg6[%c132, %c0_98] : memref<448x16xf32, #tpu.memory_space<vmem>>, vector<4x16xf32>
    tpu.vector_store %arg6[%c132, %c0_98], %184 {strides = array<i32>} : memref<448x16xf32, #tpu.memory_space<vmem>>, vector<4x16xf32>,
    %186 = vector.extract_strided_slice %175 {offsets = [20, 0], sizes = [4, 16], strides = [1, 1]} : vector<64x16xf32> to vector<4x16xf32>
    %c160 = arith.constant 160 : index
    %c0_99 = arith.constant 0 : index
    %187 = vector.load %arg6[%c160, %c0_99] : memref<448x16xf32, #tpu.memory_space<vmem>>, vector<4x16xf32>
    tpu.vector_store %arg6[%c160, %c0_99], %186 {strides = array<i32>} : memref<448x16xf32, #tpu.memory_space<vmem>>, vector<4x16xf32>,
    %188 = vector.extract_strided_slice %175 {offsets = [24, 0], sizes = [4, 16], strides = [1, 1]} : vector<64x16xf32> to vector<4x16xf32>
    %c188 = arith.constant 188 : index
    %c0_100 = arith.constant 0 : index
    %189 = vector.load %arg6[%c188, %c0_100] : memref<448x16xf32, #tpu.memory_space<vmem>>, vector<4x16xf32>
    tpu.vector_store %arg6[%c188, %c0_100], %188 {strides = array<i32>} : memref<448x16xf32, #tpu.memory_space<vmem>>, vector<4x16xf32>,
    %190 = vector.extract_strided_slice %175 {offsets = [28, 0], sizes = [4, 16], strides = [1, 1]} : vector<64x16xf32> to vector<4x16xf32>
    %c216 = arith.constant 216 : index
    %c0_101 = arith.constant 0 : index
    %191 = vector.load %arg6[%c216, %c0_101] : memref<448x16xf32, #tpu.memory_space<vmem>>, vector<4x16xf32>
    tpu.vector_store %arg6[%c216, %c0_101], %190 {strides = array<i32>} : memref<448x16xf32, #tpu.memory_space<vmem>>, vector<4x16xf32>,
    %192 = vector.extract_strided_slice %175 {offsets = [32, 0], sizes = [4, 16], strides = [1, 1]} : vector<64x16xf32> to vector<4x16xf32>
    %c244 = arith.constant 244 : index
    %c0_102 = arith.constant 0 : index
    %193 = vector.load %arg6[%c244, %c0_102] : memref<448x16xf32, #tpu.memory_space<vmem>>, vector<4x16xf32>
    tpu.vector_store %arg6[%c244, %c0_102], %192 {strides = array<i32>} : memref<448x16xf32, #tpu.memory_space<vmem>>, vector<4x16xf32>,
    %194 = vector.extract_strided_slice %175 {offsets = [36, 0], sizes = [4, 16], strides = [1, 1]} : vector<64x16xf32> to vector<4x16xf32>
    %c272 = arith.constant 272 : index
    %c0_103 = arith.constant 0 : index
    %195 = vector.load %arg6[%c272, %c0_103] : memref<448x16xf32, #tpu.memory_space<vmem>>, vector<4x16xf32>
    tpu.vector_store %arg6[%c272, %c0_103], %194 {strides = array<i32>} : memref<448x16xf32, #tpu.memory_space<vmem>>, vector<4x16xf32>,
    %196 = vector.extract_strided_slice %175 {offsets = [40, 0], sizes = [4, 16], strides = [1, 1]} : vector<64x16xf32> to vector<4x16xf32>
    %c300 = arith.constant 300 : index
    %c0_104 = arith.constant 0 : index
    %197 = vector.load %arg6[%c300, %c0_104] : memref<448x16xf32, #tpu.memory_space<vmem>>, vector<4x16xf32>
    tpu.vector_store %arg6[%c300, %c0_104], %196 {strides = array<i32>} : memref<448x16xf32, #tpu.memory_space<vmem>>, vector<4x16xf32>,
    %198 = vector.extract_strided_slice %175 {offsets = [44, 0], sizes = [4, 16], strides = [1, 1]} : vector<64x16xf32> to vector<4x16xf32>
    %c328 = arith.constant 328 : index
    %c0_105 = arith.constant 0 : index
    %199 = vector.load %arg6[%c328, %c0_105] : memref<448x16xf32, #tpu.memory_space<vmem>>, vector<4x16xf32>
    tpu.vector_store %arg6[%c328, %c0_105], %198 {strides = array<i32>} : memref<448x16xf32, #tpu.memory_space<vmem>>, vector<4x16xf32>,
    %200 = vector.extract_strided_slice %175 {offsets = [48, 0], sizes = [4, 16], strides = [1, 1]} : vector<64x16xf32> to vector<4x16xf32>
    %c356 = arith.constant 356 : index
    %c0_106 = arith.constant 0 : index
    %201 = vector.load %arg6[%c356, %c0_106] : memref<448x16xf32, #tpu.memory_space<vmem>>, vector<4x16xf32>
    tpu.vector_store %arg6[%c356, %c0_106], %200 {strides = array<i32>} : memref<448x16xf32, #tpu.memory_space<vmem>>, vector<4x16xf32>,
    %202 = vector.extract_strided_slice %175 {offsets = [52, 0], sizes = [4, 16], strides = [1, 1]} : vector<64x16xf32> to vector<4x16xf32>
    %c384 = arith.constant 384 : index
    %c0_107 = arith.constant 0 : index
    %203 = vector.load %arg6[%c384, %c0_107] : memref<448x16xf32, #tpu.memory_space<vmem>>, vector<4x16xf32>
    tpu.vector_store %arg6[%c384, %c0_107], %202 {strides = array<i32>} : memref<448x16xf32, #tpu.memory_space<vmem>>, vector<4x16xf32>,
    %204 = vector.extract_strided_slice %175 {offsets = [56, 0], sizes = [4, 16], strides = [1, 1]} : vector<64x16xf32> to vector<4x16xf32>
    %c412 = arith.constant 412 : index
    %c0_108 = arith.constant 0 : index
    %205 = vector.load %arg6[%c412, %c0_108] : memref<448x16xf32, #tpu.memory_space<vmem>>, vector<4x16xf32>
    tpu.vector_store %arg6[%c412, %c0_108], %204 {strides = array<i32>} : memref<448x16xf32, #tpu.memory_space<vmem>>, vector<4x16xf32>,
    %206 = vector.extract_strided_slice %175 {offsets = [60, 0], sizes = [4, 16], strides = [1, 1]} : vector<64x16xf32> to vector<4x16xf32>
    %c440 = arith.constant 440 : index
    %c0_109 = arith.constant 0 : index
    %207 = vector.load %arg6[%c440, %c0_109] : memref<448x16xf32, #tpu.memory_space<vmem>>, vector<4x16xf32>
    tpu.vector_store %arg6[%c440, %c0_109], %206 {strides = array<i32>} : memref<448x16xf32, #tpu.memory_space<vmem>>, vector<4x16xf32>,
    %208 = arith.truncf %175 : vector<64x16xf32> to vector<64x16xbf16>
    %cst_110 = arith.constant dense<0.000000e+00> : vector<64x16xf32>
    %209 = tpu.matmul %208, %174, %cst_110 {dimension_numbers = #tpu.dot_dimension_numbers<[1], [0], [0], [1], [0, 0, 1, 1], [], []>} : vector<64x16xbf16>, vector<16x16xbf16>, vector<64x16xf32> -> vector<64x16xf32>
    %210 = vector.extract_strided_slice %209 {offsets = [0, 0], sizes = [4, 16], strides = [1, 1]} : vector<64x16xf32> to vector<4x16xf32>
    %c24 = arith.constant 24 : index
    %c0_111 = arith.constant 0 : index
    %211 = vector.load %arg6[%c24, %c0_111] : memref<448x16xf32, #tpu.memory_space<vmem>>, vector<4x16xf32>
    tpu.vector_store %arg6[%c24, %c0_111], %210 {strides = array<i32>} : memref<448x16xf32, #tpu.memory_space<vmem>>, vector<4x16xf32>,
    %212 = vector.extract_strided_slice %209 {offsets = [4, 0], sizes = [4, 16], strides = [1, 1]} : vector<64x16xf32> to vector<4x16xf32>
    %c52 = arith.constant 52 : index
    %c0_112 = arith.constant 0 : index
    %213 = vector.load %arg6[%c52, %c0_112] : memref<448x16xf32, #tpu.memory_space<vmem>>, vector<4x16xf32>
    tpu.vector_store %arg6[%c52, %c0_112], %212 {strides = array<i32>} : memref<448x16xf32, #tpu.memory_space<vmem>>, vector<4x16xf32>,
    %214 = vector.extract_strided_slice %209 {offsets = [8, 0], sizes = [4, 16], strides = [1, 1]} : vector<64x16xf32> to vector<4x16xf32>
    %c80 = arith.constant 80 : index
    %c0_113 = arith.constant 0 : index
    %215 = vector.load %arg6[%c80, %c0_113] : memref<448x16xf32, #tpu.memory_space<vmem>>, vector<4x16xf32>
    tpu.vector_store %arg6[%c80, %c0_113], %214 {strides = array<i32>} : memref<448x16xf32, #tpu.memory_space<vmem>>, vector<4x16xf32>,
    %216 = vector.extract_strided_slice %209 {offsets = [12, 0], sizes = [4, 16], strides = [1, 1]} : vector<64x16xf32> to vector<4x16xf32>
    %c108 = arith.constant 108 : index
    %c0_114 = arith.constant 0 : index
    %217 = vector.load %arg6[%c108, %c0_114] : memref<448x16xf32, #tpu.memory_space<vmem>>, vector<4x16xf32>
    tpu.vector_store %arg6[%c108, %c0_114], %216 {strides = array<i32>} : memref<448x16xf32, #tpu.memory_space<vmem>>, vector<4x16xf32>,
    %218 = vector.extract_strided_slice %209 {offsets = [16, 0], sizes = [4, 16], strides = [1, 1]} : vector<64x16xf32> to vector<4x16xf32>
    %c136 = arith.constant 136 : index
    %c0_115 = arith.constant 0 : index
    %219 = vector.load %arg6[%c136, %c0_115] : memref<448x16xf32, #tpu.memory_space<vmem>>, vector<4x16xf32>
    tpu.vector_store %arg6[%c136, %c0_115], %218 {strides = array<i32>} : memref<448x16xf32, #tpu.memory_space<vmem>>, vector<4x16xf32>,
    %220 = vector.extract_strided_slice %209 {offsets = [20, 0], sizes = [4, 16], strides = [1, 1]} : vector<64x16xf32> to vector<4x16xf32>
    %c164 = arith.constant 164 : index
    %c0_116 = arith.constant 0 : index
    %221 = vector.load %arg6[%c164, %c0_116] : memref<448x16xf32, #tpu.memory_space<vmem>>, vector<4x16xf32>
    tpu.vector_store %arg6[%c164, %c0_116], %220 {strides = array<i32>} : memref<448x16xf32, #tpu.memory_space<vmem>>, vector<4x16xf32>,
    %222 = vector.extract_strided_slice %209 {offsets = [24, 0], sizes = [4, 16], strides = [1, 1]} : vector<64x16xf32> to vector<4x16xf32>
    %c192 = arith.constant 192 : index
    %c0_117 = arith.constant 0 : index
    %223 = vector.load %arg6[%c192, %c0_117] : memref<448x16xf32, #tpu.memory_space<vmem>>, vector<4x16xf32>
    tpu.vector_store %arg6[%c192, %c0_117], %222 {strides = array<i32>} : memref<448x16xf32, #tpu.memory_space<vmem>>, vector<4x16xf32>,
    %224 = vector.extract_strided_slice %209 {offsets = [28, 0], sizes = [4, 16], strides = [1, 1]} : vector<64x16xf32> to vector<4x16xf32>
    %c220 = arith.constant 220 : index
    %c0_118 = arith.constant 0 : index
    %225 = vector.load %arg6[%c220, %c0_118] : memref<448x16xf32, #tpu.memory_space<vmem>>, vector<4x16xf32>
    tpu.vector_store %arg6[%c220, %c0_118], %224 {strides = array<i32>} : memref<448x16xf32, #tpu.memory_space<vmem>>, vector<4x16xf32>,
    %226 = vector.extract_strided_slice %209 {offsets = [32, 0], sizes = [4, 16], strides = [1, 1]} : vector<64x16xf32> to vector<4x16xf32>
    %c248 = arith.constant 248 : index
    %c0_119 = arith.constant 0 : index
    %227 = vector.load %arg6[%c248, %c0_119] : memref<448x16xf32, #tpu.memory_space<vmem>>, vector<4x16xf32>
    tpu.vector_store %arg6[%c248, %c0_119], %226 {strides = array<i32>} : memref<448x16xf32, #tpu.memory_space<vmem>>, vector<4x16xf32>,
    %228 = vector.extract_strided_slice %209 {offsets = [36, 0], sizes = [4, 16], strides = [1, 1]} : vector<64x16xf32> to vector<4x16xf32>
    %c276 = arith.constant 276 : index
    %c0_120 = arith.constant 0 : index
    %229 = vector.load %arg6[%c276, %c0_120] : memref<448x16xf32, #tpu.memory_space<vmem>>, vector<4x16xf32>
    tpu.vector_store %arg6[%c276, %c0_120], %228 {strides = array<i32>} : memref<448x16xf32, #tpu.memory_space<vmem>>, vector<4x16xf32>,
    %230 = vector.extract_strided_slice %209 {offsets = [40, 0], sizes = [4, 16], strides = [1, 1]} : vector<64x16xf32> to vector<4x16xf32>
    %c304 = arith.constant 304 : index
    %c0_121 = arith.constant 0 : index
    %231 = vector.load %arg6[%c304, %c0_121] : memref<448x16xf32, #tpu.memory_space<vmem>>, vector<4x16xf32>
    tpu.vector_store %arg6[%c304, %c0_121], %230 {strides = array<i32>} : memref<448x16xf32, #tpu.memory_space<vmem>>, vector<4x16xf32>,
    %232 = vector.extract_strided_slice %209 {offsets = [44, 0], sizes = [4, 16], strides = [1, 1]} : vector<64x16xf32> to vector<4x16xf32>
    %c332 = arith.constant 332 : index
    %c0_122 = arith.constant 0 : index
    %233 = vector.load %arg6[%c332, %c0_122] : memref<448x16xf32, #tpu.memory_space<vmem>>, vector<4x16xf32>
    tpu.vector_store %arg6[%c332, %c0_122], %232 {strides = array<i32>} : memref<448x16xf32, #tpu.memory_space<vmem>>, vector<4x16xf32>,
    %234 = vector.extract_strided_slice %209 {offsets = [48, 0], sizes = [4, 16], strides = [1, 1]} : vector<64x16xf32> to vector<4x16xf32>
    %c360 = arith.constant 360 : index
    %c0_123 = arith.constant 0 : index
    %235 = vector.load %arg6[%c360, %c0_123] : memref<448x16xf32, #tpu.memory_space<vmem>>, vector<4x16xf32>
    tpu.vector_store %arg6[%c360, %c0_123], %234 {strides = array<i32>} : memref<448x16xf32, #tpu.memory_space<vmem>>, vector<4x16xf32>,
    %236 = vector.extract_strided_slice %209 {offsets = [52, 0], sizes = [4, 16], strides = [1, 1]} : vector<64x16xf32> to vector<4x16xf32>
    %c388 = arith.constant 388 : index
    %c0_124 = arith.constant 0 : index
    %237 = vector.load %arg6[%c388, %c0_124] : memref<448x16xf32, #tpu.memory_space<vmem>>, vector<4x16xf32>
    tpu.vector_store %arg6[%c388, %c0_124], %236 {strides = array<i32>} : memref<448x16xf32, #tpu.memory_space<vmem>>, vector<4x16xf32>,
    %238 = vector.extract_strided_slice %209 {offsets = [56, 0], sizes = [4, 16], strides = [1, 1]} : vector<64x16xf32> to vector<4x16xf32>
    %c416 = arith.constant 416 : index
    %c0_125 = arith.constant 0 : index
    %239 = vector.load %arg6[%c416, %c0_125] : memref<448x16xf32, #tpu.memory_space<vmem>>, vector<4x16xf32>
    tpu.vector_store %arg6[%c416, %c0_125], %238 {strides = array<i32>} : memref<448x16xf32, #tpu.memory_space<vmem>>, vector<4x16xf32>,
    %240 = vector.extract_strided_slice %209 {offsets = [60, 0], sizes = [4, 16], strides = [1, 1]} : vector<64x16xf32> to vector<4x16xf32>
    %c444 = arith.constant 444 : index
    %c0_126 = arith.constant 0 : index
    %241 = vector.load %arg6[%c444, %c0_126] : memref<448x16xf32, #tpu.memory_space<vmem>>, vector<4x16xf32>
    tpu.vector_store %arg6[%c444, %c0_126], %240 {strides = array<i32>} : memref<448x16xf32, #tpu.memory_space<vmem>>, vector<4x16xf32>,
    %c0_127 = arith.constant 0 : index
    %c0_128 = arith.constant 0 : index
    %242 = vector.load %arg3[%c0_127, %c0_128] : memref<8x28xbf16, #tpu.memory_space<vmem>>, vector<8x28xbf16>
    %c0_129 = arith.constant 0 : index
    %c0_130 = arith.constant 0 : index
    %243 = vector.load %arg4[%c0_129, %c0_130] : memref<8x1xf32, #tpu.memory_space<vmem>>, vector<8x1xf32>
    %c0_131 = arith.constant 0 : index
    %c0_132 = arith.constant 0 : index
    %244 = vector.load %arg6[%c0_131, %c0_132] : memref<448x16xf32, #tpu.memory_space<vmem>>, vector<28x16xf32>
    %245 = arith.truncf %244 : vector<28x16xf32> to vector<28x16xbf16>
    %cst_133 = arith.constant dense<0.000000e+00> : vector<8x16xf32>
    %246 = tpu.matmul %242, %245, %cst_133 {dimension_numbers = #tpu.dot_dimension_numbers<[1], [0], [0], [1], [0, 0, 1, 1], [], []>} : vector<8x28xbf16>, vector<28x16xbf16>, vector<8x16xf32> -> vector<8x16xf32>
    %247 = vector.broadcast %243 : vector<8x1xf32> to vector<8x16xf32>
    %248 = arith.addf %246, %247 : vector<8x16xf32>
    %c0_134 = arith.constant 0 : index
    %c0_135 = arith.constant 0 : index
    %c0_136 = arith.constant 0 : index
    %249 = vector.load %arg5[%c0_134, %c0_135, %c0_136] : memref<1x128x16xf32, #tpu.memory_space<vmem>>, vector<1x8x16xf32>
    %250 = vector.shape_cast %249 : vector<1x8x16xf32> to vector<8x16xf32>
    %251 = vector.shape_cast %248 : vector<8x16xf32> to vector<1x8x16xf32>
    tpu.vector_store %arg5[%c0_134, %c0_135, %c0_136], %251 {strides = array<i32>} : memref<1x128x16xf32, #tpu.memory_space<vmem>>, vector<1x8x16xf32>,
    %c28_137 = arith.constant 28 : index
    %c0_138 = arith.constant 0 : index
    %252 = vector.load %arg6[%c28_137, %c0_138] : memref<448x16xf32, #tpu.memory_space<vmem>>, vector<28x16xf32>
    %253 = arith.truncf %252 : vector<28x16xf32> to vector<28x16xbf16>
    %cst_139 = arith.constant dense<0.000000e+00> : vector<8x16xf32>
    %254 = tpu.matmul %242, %253, %cst_139 {dimension_numbers = #tpu.dot_dimension_numbers<[1], [0], [0], [1], [0, 0, 1, 1], [], []>} : vector<8x28xbf16>, vector<28x16xbf16>, vector<8x16xf32> -> vector<8x16xf32>
    %255 = vector.broadcast %243 : vector<8x1xf32> to vector<8x16xf32>
    %256 = arith.addf %254, %255 : vector<8x16xf32>
    %c0_140 = arith.constant 0 : index
    %c8_141 = arith.constant 8 : index
    %c0_142 = arith.constant 0 : index
    %257 = vector.load %arg5[%c0_140, %c8_141, %c0_142] : memref<1x128x16xf32, #tpu.memory_space<vmem>>, vector<1x8x16xf32>
    %258 = vector.shape_cast %257 : vector<1x8x16xf32> to vector<8x16xf32>
    %259 = vector.shape_cast %256 : vector<8x16xf32> to vector<1x8x16xf32>
    tpu.vector_store %arg5[%c0_140, %c8_141, %c0_142], %259 {strides = array<i32>} : memref<1x128x16xf32, #tpu.memory_space<vmem>>, vector<1x8x16xf32>,
    %c56_143 = arith.constant 56 : index
    %c0_144 = arith.constant 0 : index
    %260 = vector.load %arg6[%c56_143, %c0_144] : memref<448x16xf32, #tpu.memory_space<vmem>>, vector<28x16xf32>
    %261 = arith.truncf %260 : vector<28x16xf32> to vector<28x16xbf16>
    %cst_145 = arith.constant dense<0.000000e+00> : vector<8x16xf32>
    %262 = tpu.matmul %242, %261, %cst_145 {dimension_numbers = #tpu.dot_dimension_numbers<[1], [0], [0], [1], [0, 0, 1, 1], [], []>} : vector<8x28xbf16>, vector<28x16xbf16>, vector<8x16xf32> -> vector<8x16xf32>
    %263 = vector.broadcast %243 : vector<8x1xf32> to vector<8x16xf32>
    %264 = arith.addf %262, %263 : vector<8x16xf32>
    %c0_146 = arith.constant 0 : index
    %c16_147 = arith.constant 16 : index
    %c0_148 = arith.constant 0 : index
    %265 = vector.load %arg5[%c0_146, %c16_147, %c0_148] : memref<1x128x16xf32, #tpu.memory_space<vmem>>, vector<1x8x16xf32>
    %266 = vector.shape_cast %265 : vector<1x8x16xf32> to vector<8x16xf32>
    %267 = vector.shape_cast %264 : vector<8x16xf32> to vector<1x8x16xf32>
    tpu.vector_store %arg5[%c0_146, %c16_147, %c0_148], %267 {strides = array<i32>} : memref<1x128x16xf32, #tpu.memory_space<vmem>>, vector<1x8x16xf32>,
    %c84_149 = arith.constant 84 : index
    %c0_150 = arith.constant 0 : index
    %268 = vector.load %arg6[%c84_149, %c0_150] : memref<448x16xf32, #tpu.memory_space<vmem>>, vector<28x16xf32>
    %269 = arith.truncf %268 : vector<28x16xf32> to vector<28x16xbf16>
    %cst_151 = arith.constant dense<0.000000e+00> : vector<8x16xf32>
    %270 = tpu.matmul %242, %269, %cst_151 {dimension_numbers = #tpu.dot_dimension_numbers<[1], [0], [0], [1], [0, 0, 1, 1], [], []>} : vector<8x28xbf16>, vector<28x16xbf16>, vector<8x16xf32> -> vector<8x16xf32>
    %271 = vector.broadcast %243 : vector<8x1xf32> to vector<8x16xf32>
    %272 = arith.addf %270, %271 : vector<8x16xf32>
    %c0_152 = arith.constant 0 : index
    %c24_153 = arith.constant 24 : index
    %c0_154 = arith.constant 0 : index
    %273 = vector.load %arg5[%c0_152, %c24_153, %c0_154] : memref<1x128x16xf32, #tpu.memory_space<vmem>>, vector<1x8x16xf32>
    %274 = vector.shape_cast %273 : vector<1x8x16xf32> to vector<8x16xf32>
    %275 = vector.shape_cast %272 : vector<8x16xf32> to vector<1x8x16xf32>
    tpu.vector_store %arg5[%c0_152, %c24_153, %c0_154], %275 {strides = array<i32>} : memref<1x128x16xf32, #tpu.memory_space<vmem>>, vector<1x8x16xf32>,
    %c112_155 = arith.constant 112 : index
    %c0_156 = arith.constant 0 : index
    %276 = vector.load %arg6[%c112_155, %c0_156] : memref<448x16xf32, #tpu.memory_space<vmem>>, vector<28x16xf32>
    %277 = arith.truncf %276 : vector<28x16xf32> to vector<28x16xbf16>
    %cst_157 = arith.constant dense<0.000000e+00> : vector<8x16xf32>
    %278 = tpu.matmul %242, %277, %cst_157 {dimension_numbers = #tpu.dot_dimension_numbers<[1], [0], [0], [1], [0, 0, 1, 1], [], []>} : vector<8x28xbf16>, vector<28x16xbf16>, vector<8x16xf32> -> vector<8x16xf32>
    %279 = vector.broadcast %243 : vector<8x1xf32> to vector<8x16xf32>
    %280 = arith.addf %278, %279 : vector<8x16xf32>
    %c0_158 = arith.constant 0 : index
    %c32_159 = arith.constant 32 : index
    %c0_160 = arith.constant 0 : index
    %281 = vector.load %arg5[%c0_158, %c32_159, %c0_160] : memref<1x128x16xf32, #tpu.memory_space<vmem>>, vector<1x8x16xf32>
    %282 = vector.shape_cast %281 : vector<1x8x16xf32> to vector<8x16xf32>
    %283 = vector.shape_cast %280 : vector<8x16xf32> to vector<1x8x16xf32>
    tpu.vector_store %arg5[%c0_158, %c32_159, %c0_160], %283 {strides = array<i32>} : memref<1x128x16xf32, #tpu.memory_space<vmem>>, vector<1x8x16xf32>,
    %c140_161 = arith.constant 140 : index
    %c0_162 = arith.constant 0 : index
    %284 = vector.load %arg6[%c140_161, %c0_162] : memref<448x16xf32, #tpu.memory_space<vmem>>, vector<28x16xf32>
    %285 = arith.truncf %284 : vector<28x16xf32> to vector<28x16xbf16>
    %cst_163 = arith.constant dense<0.000000e+00> : vector<8x16xf32>
    %286 = tpu.matmul %242, %285, %cst_163 {dimension_numbers = #tpu.dot_dimension_numbers<[1], [0], [0], [1], [0, 0, 1, 1], [], []>} : vector<8x28xbf16>, vector<28x16xbf16>, vector<8x16xf32> -> vector<8x16xf32>
    %287 = vector.broadcast %243 : vector<8x1xf32> to vector<8x16xf32>
    %288 = arith.addf %286, %287 : vector<8x16xf32>
    %c0_164 = arith.constant 0 : index
    %c40_165 = arith.constant 40 : index
    %c0_166 = arith.constant 0 : index
    %289 = vector.load %arg5[%c0_164, %c40_165, %c0_166] : memref<1x128x16xf32, #tpu.memory_space<vmem>>, vector<1x8x16xf32>
    %290 = vector.shape_cast %289 : vector<1x8x16xf32> to vector<8x16xf32>
    %291 = vector.shape_cast %288 : vector<8x16xf32> to vector<1x8x16xf32>
    tpu.vector_store %arg5[%c0_164, %c40_165, %c0_166], %291 {strides = array<i32>} : memref<1x128x16xf32, #tpu.memory_space<vmem>>, vector<1x8x16xf32>,
    %c168_167 = arith.constant 168 : index
    %c0_168 = arith.constant 0 : index
    %292 = vector.load %arg6[%c168_167, %c0_168] : memref<448x16xf32, #tpu.memory_space<vmem>>, vector<28x16xf32>
    %293 = arith.truncf %292 : vector<28x16xf32> to vector<28x16xbf16>
    %cst_169 = arith.constant dense<0.000000e+00> : vector<8x16xf32>
    %294 = tpu.matmul %242, %293, %cst_169 {dimension_numbers = #tpu.dot_dimension_numbers<[1], [0], [0], [1], [0, 0, 1, 1], [], []>} : vector<8x28xbf16>, vector<28x16xbf16>, vector<8x16xf32> -> vector<8x16xf32>
    %295 = vector.broadcast %243 : vector<8x1xf32> to vector<8x16xf32>
    %296 = arith.addf %294, %295 : vector<8x16xf32>
    %c0_170 = arith.constant 0 : index
    %c48_171 = arith.constant 48 : index
    %c0_172 = arith.constant 0 : index
    %297 = vector.load %arg5[%c0_170, %c48_171, %c0_172] : memref<1x128x16xf32, #tpu.memory_space<vmem>>, vector<1x8x16xf32>
    %298 = vector.shape_cast %297 : vector<1x8x16xf32> to vector<8x16xf32>
    %299 = vector.shape_cast %296 : vector<8x16xf32> to vector<1x8x16xf32>
    tpu.vector_store %arg5[%c0_170, %c48_171, %c0_172], %299 {strides = array<i32>} : memref<1x128x16xf32, #tpu.memory_space<vmem>>, vector<1x8x16xf32>,
    %c196_173 = arith.constant 196 : index
    %c0_174 = arith.constant 0 : index
    %300 = vector.load %arg6[%c196_173, %c0_174] : memref<448x16xf32, #tpu.memory_space<vmem>>, vector<28x16xf32>
    %301 = arith.truncf %300 : vector<28x16xf32> to vector<28x16xbf16>
    %cst_175 = arith.constant dense<0.000000e+00> : vector<8x16xf32>
    %302 = tpu.matmul %242, %301, %cst_175 {dimension_numbers = #tpu.dot_dimension_numbers<[1], [0], [0], [1], [0, 0, 1, 1], [], []>} : vector<8x28xbf16>, vector<28x16xbf16>, vector<8x16xf32> -> vector<8x16xf32>
    %303 = vector.broadcast %243 : vector<8x1xf32> to vector<8x16xf32>
    %304 = arith.addf %302, %303 : vector<8x16xf32>
    %c0_176 = arith.constant 0 : index
    %c56_177 = arith.constant 56 : index
    %c0_178 = arith.constant 0 : index
    %305 = vector.load %arg5[%c0_176, %c56_177, %c0_178] : memref<1x128x16xf32, #tpu.memory_space<vmem>>, vector<1x8x16xf32>
    %306 = vector.shape_cast %305 : vector<1x8x16xf32> to vector<8x16xf32>
    %307 = vector.shape_cast %304 : vector<8x16xf32> to vector<1x8x16xf32>
    tpu.vector_store %arg5[%c0_176, %c56_177, %c0_178], %307 {strides = array<i32>} : memref<1x128x16xf32, #tpu.memory_space<vmem>>, vector<1x8x16xf32>,
    %c224_179 = arith.constant 224 : index
    %c0_180 = arith.constant 0 : index
    %308 = vector.load %arg6[%c224_179, %c0_180] : memref<448x16xf32, #tpu.memory_space<vmem>>, vector<28x16xf32>
    %309 = arith.truncf %308 : vector<28x16xf32> to vector<28x16xbf16>
    %cst_181 = arith.constant dense<0.000000e+00> : vector<8x16xf32>
    %310 = tpu.matmul %242, %309, %cst_181 {dimension_numbers = #tpu.dot_dimension_numbers<[1], [0], [0], [1], [0, 0, 1, 1], [], []>} : vector<8x28xbf16>, vector<28x16xbf16>, vector<8x16xf32> -> vector<8x16xf32>
    %311 = vector.broadcast %243 : vector<8x1xf32> to vector<8x16xf32>
    %312 = arith.addf %310, %311 : vector<8x16xf32>
    %c0_182 = arith.constant 0 : index
    %c64_183 = arith.constant 64 : index
    %c0_184 = arith.constant 0 : index
    %313 = vector.load %arg5[%c0_182, %c64_183, %c0_184] : memref<1x128x16xf32, #tpu.memory_space<vmem>>, vector<1x8x16xf32>
    %314 = vector.shape_cast %313 : vector<1x8x16xf32> to vector<8x16xf32>
    %315 = vector.shape_cast %312 : vector<8x16xf32> to vector<1x8x16xf32>
    tpu.vector_store %arg5[%c0_182, %c64_183, %c0_184], %315 {strides = array<i32>} : memref<1x128x16xf32, #tpu.memory_space<vmem>>, vector<1x8x16xf32>,
    %c252_185 = arith.constant 252 : index
    %c0_186 = arith.constant 0 : index
    %316 = vector.load %arg6[%c252_185, %c0_186] : memref<448x16xf32, #tpu.memory_space<vmem>>, vector<28x16xf32>
    %317 = arith.truncf %316 : vector<28x16xf32> to vector<28x16xbf16>
    %cst_187 = arith.constant dense<0.000000e+00> : vector<8x16xf32>
    %318 = tpu.matmul %242, %317, %cst_187 {dimension_numbers = #tpu.dot_dimension_numbers<[1], [0], [0], [1], [0, 0, 1, 1], [], []>} : vector<8x28xbf16>, vector<28x16xbf16>, vector<8x16xf32> -> vector<8x16xf32>
    %319 = vector.broadcast %243 : vector<8x1xf32> to vector<8x16xf32>
    %320 = arith.addf %318, %319 : vector<8x16xf32>
    %c0_188 = arith.constant 0 : index
    %c72_189 = arith.constant 72 : index
    %c0_190 = arith.constant 0 : index
    %321 = vector.load %arg5[%c0_188, %c72_189, %c0_190] : memref<1x128x16xf32, #tpu.memory_space<vmem>>, vector<1x8x16xf32>
    %322 = vector.shape_cast %321 : vector<1x8x16xf32> to vector<8x16xf32>
    %323 = vector.shape_cast %320 : vector<8x16xf32> to vector<1x8x16xf32>
    tpu.vector_store %arg5[%c0_188, %c72_189, %c0_190], %323 {strides = array<i32>} : memref<1x128x16xf32, #tpu.memory_space<vmem>>, vector<1x8x16xf32>,
    %c280_191 = arith.constant 280 : index
    %c0_192 = arith.constant 0 : index
    %324 = vector.load %arg6[%c280_191, %c0_192] : memref<448x16xf32, #tpu.memory_space<vmem>>, vector<28x16xf32>
    %325 = arith.truncf %324 : vector<28x16xf32> to vector<28x16xbf16>
    %cst_193 = arith.constant dense<0.000000e+00> : vector<8x16xf32>
    %326 = tpu.matmul %242, %325, %cst_193 {dimension_numbers = #tpu.dot_dimension_numbers<[1], [0], [0], [1], [0, 0, 1, 1], [], []>} : vector<8x28xbf16>, vector<28x16xbf16>, vector<8x16xf32> -> vector<8x16xf32>
    %327 = vector.broadcast %243 : vector<8x1xf32> to vector<8x16xf32>
    %328 = arith.addf %326, %327 : vector<8x16xf32>
    %c0_194 = arith.constant 0 : index
    %c80_195 = arith.constant 80 : index
    %c0_196 = arith.constant 0 : index
    %329 = vector.load %arg5[%c0_194, %c80_195, %c0_196] : memref<1x128x16xf32, #tpu.memory_space<vmem>>, vector<1x8x16xf32>
    %330 = vector.shape_cast %329 : vector<1x8x16xf32> to vector<8x16xf32>
    %331 = vector.shape_cast %328 : vector<8x16xf32> to vector<1x8x16xf32>
    tpu.vector_store %arg5[%c0_194, %c80_195, %c0_196], %331 {strides = array<i32>} : memref<1x128x16xf32, #tpu.memory_space<vmem>>, vector<1x8x16xf32>,
    %c308_197 = arith.constant 308 : index
    %c0_198 = arith.constant 0 : index
    %332 = vector.load %arg6[%c308_197, %c0_198] : memref<448x16xf32, #tpu.memory_space<vmem>>, vector<28x16xf32>
    %333 = arith.truncf %332 : vector<28x16xf32> to vector<28x16xbf16>
    %cst_199 = arith.constant dense<0.000000e+00> : vector<8x16xf32>
    %334 = tpu.matmul %242, %333, %cst_199 {dimension_numbers = #tpu.dot_dimension_numbers<[1], [0], [0], [1], [0, 0, 1, 1], [], []>} : vector<8x28xbf16>, vector<28x16xbf16>, vector<8x16xf32> -> vector<8x16xf32>
    %335 = vector.broadcast %243 : vector<8x1xf32> to vector<8x16xf32>
    %336 = arith.addf %334, %335 : vector<8x16xf32>
    %c0_200 = arith.constant 0 : index
    %c88_201 = arith.constant 88 : index
    %c0_202 = arith.constant 0 : index
    %337 = vector.load %arg5[%c0_200, %c88_201, %c0_202] : memref<1x128x16xf32, #tpu.memory_space<vmem>>, vector<1x8x16xf32>
    %338 = vector.shape_cast %337 : vector<1x8x16xf32> to vector<8x16xf32>
    %339 = vector.shape_cast %336 : vector<8x16xf32> to vector<1x8x16xf32>
    tpu.vector_store %arg5[%c0_200, %c88_201, %c0_202], %339 {strides = array<i32>} : memref<1x128x16xf32, #tpu.memory_space<vmem>>, vector<1x8x16xf32>,
    %c336_203 = arith.constant 336 : index
    %c0_204 = arith.constant 0 : index
    %340 = vector.load %arg6[%c336_203, %c0_204] : memref<448x16xf32, #tpu.memory_space<vmem>>, vector<28x16xf32>
    %341 = arith.truncf %340 : vector<28x16xf32> to vector<28x16xbf16>
    %cst_205 = arith.constant dense<0.000000e+00> : vector<8x16xf32>
    %342 = tpu.matmul %242, %341, %cst_205 {dimension_numbers = #tpu.dot_dimension_numbers<[1], [0], [0], [1], [0, 0, 1, 1], [], []>} : vector<8x28xbf16>, vector<28x16xbf16>, vector<8x16xf32> -> vector<8x16xf32>
    %343 = vector.broadcast %243 : vector<8x1xf32> to vector<8x16xf32>
    %344 = arith.addf %342, %343 : vector<8x16xf32>
    %c0_206 = arith.constant 0 : index
    %c96_207 = arith.constant 96 : index
    %c0_208 = arith.constant 0 : index
    %345 = vector.load %arg5[%c0_206, %c96_207, %c0_208] : memref<1x128x16xf32, #tpu.memory_space<vmem>>, vector<1x8x16xf32>
    %346 = vector.shape_cast %345 : vector<1x8x16xf32> to vector<8x16xf32>
    %347 = vector.shape_cast %344 : vector<8x16xf32> to vector<1x8x16xf32>
    tpu.vector_store %arg5[%c0_206, %c96_207, %c0_208], %347 {strides = array<i32>} : memref<1x128x16xf32, #tpu.memory_space<vmem>>, vector<1x8x16xf32>,
    %c364_209 = arith.constant 364 : index
    %c0_210 = arith.constant 0 : index
    %348 = vector.load %arg6[%c364_209, %c0_210] : memref<448x16xf32, #tpu.memory_space<vmem>>, vector<28x16xf32>
    %349 = arith.truncf %348 : vector<28x16xf32> to vector<28x16xbf16>
    %cst_211 = arith.constant dense<0.000000e+00> : vector<8x16xf32>
    %350 = tpu.matmul %242, %349, %cst_211 {dimension_numbers = #tpu.dot_dimension_numbers<[1], [0], [0], [1], [0, 0, 1, 1], [], []>} : vector<8x28xbf16>, vector<28x16xbf16>, vector<8x16xf32> -> vector<8x16xf32>
    %351 = vector.broadcast %243 : vector<8x1xf32> to vector<8x16xf32>
    %352 = arith.addf %350, %351 : vector<8x16xf32>
    %c0_212 = arith.constant 0 : index
    %c104_213 = arith.constant 104 : index
    %c0_214 = arith.constant 0 : index
    %353 = vector.load %arg5[%c0_212, %c104_213, %c0_214] : memref<1x128x16xf32, #tpu.memory_space<vmem>>, vector<1x8x16xf32>
    %354 = vector.shape_cast %353 : vector<1x8x16xf32> to vector<8x16xf32>
    %355 = vector.shape_cast %352 : vector<8x16xf32> to vector<1x8x16xf32>
    tpu.vector_store %arg5[%c0_212, %c104_213, %c0_214], %355 {strides = array<i32>} : memref<1x128x16xf32, #tpu.memory_space<vmem>>, vector<1x8x16xf32>,
    %c392_215 = arith.constant 392 : index
    %c0_216 = arith.constant 0 : index
    %356 = vector.load %arg6[%c392_215, %c0_216] : memref<448x16xf32, #tpu.memory_space<vmem>>, vector<28x16xf32>
    %357 = arith.truncf %356 : vector<28x16xf32> to vector<28x16xbf16>
    %cst_217 = arith.constant dense<0.000000e+00> : vector<8x16xf32>
    %358 = tpu.matmul %242, %357, %cst_217 {dimension_numbers = #tpu.dot_dimension_numbers<[1], [0], [0], [1], [0, 0, 1, 1], [], []>} : vector<8x28xbf16>, vector<28x16xbf16>, vector<8x16xf32> -> vector<8x16xf32>
    %359 = vector.broadcast %243 : vector<8x1xf32> to vector<8x16xf32>
    %360 = arith.addf %358, %359 : vector<8x16xf32>
    %c0_218 = arith.constant 0 : index
    %c112_219 = arith.constant 112 : index
    %c0_220 = arith.constant 0 : index
    %361 = vector.load %arg5[%c0_218, %c112_219, %c0_220] : memref<1x128x16xf32, #tpu.memory_space<vmem>>, vector<1x8x16xf32>
    %362 = vector.shape_cast %361 : vector<1x8x16xf32> to vector<8x16xf32>
    %363 = vector.shape_cast %360 : vector<8x16xf32> to vector<1x8x16xf32>
    tpu.vector_store %arg5[%c0_218, %c112_219, %c0_220], %363 {strides = array<i32>} : memref<1x128x16xf32, #tpu.memory_space<vmem>>, vector<1x8x16xf32>,
    %c420_221 = arith.constant 420 : index
    %c0_222 = arith.constant 0 : index
    %364 = vector.load %arg6[%c420_221, %c0_222] : memref<448x16xf32, #tpu.memory_space<vmem>>, vector<28x16xf32>
    %365 = arith.truncf %364 : vector<28x16xf32> to vector<28x16xbf16>
    %cst_223 = arith.constant dense<0.000000e+00> : vector<8x16xf32>
    %366 = tpu.matmul %242, %365, %cst_223 {dimension_numbers = #tpu.dot_dimension_numbers<[1], [0], [0], [1], [0, 0, 1, 1], [], []>} : vector<8x28xbf16>, vector<28x16xbf16>, vector<8x16xf32> -> vector<8x16xf32>
    %367 = vector.broadcast %243 : vector<8x1xf32> to vector<8x16xf32>
    %368 = arith.addf %366, %367 : vector<8x16xf32>
    %c0_224 = arith.constant 0 : index
    %c120_225 = arith.constant 120 : index
    %c0_226 = arith.constant 0 : index
    %369 = vector.load %arg5[%c0_224, %c120_225, %c0_226] : memref<1x128x16xf32, #tpu.memory_space<vmem>>, vector<1x8x16xf32>
    %370 = vector.shape_cast %369 : vector<1x8x16xf32> to vector<8x16xf32>
    %371 = vector.shape_cast %368 : vector<8x16xf32> to vector<1x8x16xf32>
    tpu.vector_store %arg5[%c0_224, %c120_225, %c0_226], %371 {strides = array<i32>} : memref<1x128x16xf32, #tpu.memory_space<vmem>>, vector<1x8x16xf32>,
    return
  }
  func.func @transform_0(%arg0: i32) -> (i32, i32, i32) {
    %c0_i32 = arith.constant 0 : i32
    %c0_i32_0 = arith.constant 0 : i32
    %c0_i32_1 = arith.constant 0 : i32
    return %arg0, %c0_i32, %c0_i32_0 : i32, i32, i32
  }
  func.func @transform_1(%arg0: i32) -> (i32, i32, i32) {
    %c0_i32 = arith.constant 0 : i32
    %c0_i32_0 = arith.constant 0 : i32
    %c0_i32_1 = arith.constant 0 : i32
    %c0_i32_2 = arith.constant 0 : i32
    return %c0_i32, %c0_i32_0, %c0_i32_1 : i32, i32, i32
  }
  func.func @transform_2(%arg0: i32) -> (i32, i32) {
    %c0_i32 = arith.constant 0 : i32
    %c0_i32_0 = arith.constant 0 : i32
    %c0_i32_1 = arith.constant 0 : i32
    return %c0_i32, %c0_i32_0 : i32, i32
  }
  func.func @transform_3(%arg0: i32) -> (i32, i32) {
    %c0_i32 = arith.constant 0 : i32
    %c0_i32_0 = arith.constant 0 : i32
    %c0_i32_1 = arith.constant 0 : i32
    return %c0_i32, %c0_i32_0 : i32, i32
  }
  func.func @transform_4(%arg0: i32) -> (i32, i32, i32) {
    %c0_i32 = arith.constant 0 : i32
    %c0_i32_0 = arith.constant 0 : i32
    %c0_i32_1 = arith.constant 0 : i32
    return %arg0, %c0_i32, %c0_i32_0 : i32, i32, i32
  }
}

</mosaic_0001>

<bundles_post_ra>
// kernel: gcn_forward.1
= control target key start
LH: loop header
LB: loop body
LE: loop exit
PB: predicated region body
PF: predicated region fallthrough
CT: control target
= control target key end

     0   :  { %s2078_s15 = smov 0   ;;  %s2428_s0 = inlined_call_operand.vmem [shape: bf16[2,64,16], index: 0, kind: input, shape index: {}]   ;;  %s2429_s1 = inlined_call_operand.vmem [shape: bf16[3,16,16], index: 1, kind: input, shape index: {}]   ;;  %s2430_s2 = inlined_call_operand.vmem [shape: bf16[8,28], index: 2, kind: input, shape index: {}]   ;;  %s2431_s3 = inlined_call_operand.vmem [shape: f32[8,1], index: 3, kind: input, shape index: {}]   ;;  %s2432_s4 = inlined_call_operand.vmem [shape: f32[2,128,16], index: 4, kind: output, shape index: {}]  }
   0x1 LB: > { %s1693_s16 = sadd.s32 4294967295, %s2048_s15   ;;  %p1697_p0 = scmp.ge.s32.totalorder %s2048_s15, 1  ;;  %s2048_s15 = sphi %s2078_s15, %s14_s15  }
   0x2   : > { %p162_p1 = scmp.lt.s32.totalorder %s2048_s15, 3 }
   0x4   : > { %p163_p2 = pnand %p1697_p0, %p162_p1 }
   0x5   : > { %p188_p3 = scmp.lt.s32.totalorder (!%p163_p2), %s1693_s16, 1 }
   0x6   : > { %166 = sbr.rel (%p163_p2) target bundleno = 719 (0x2cf), region = 36 }
   0xb   : > { %v2035_v0 = vld [vmem:[%s2429_s1] sm:$0xff]   ;;  %v2092_v1 = vld [vmem:[%s2429_s1 + $0x8] sm:$0xff]   ;;  %s2434_s16 = smov (!%p188_p3, %s1693_s16), 1  ;;  %vm215_vm0 = vcmask 125952   ;;  %vm217_vm1 = vcmask 130052   ;;  %vm261_vm2 = vcmask 130048  }
   0xc   : > { %1835 = vmatprep.subr.bf16.mxu0 %v2035_v0  ;;  %1845 = vmatprep.subr.bf16.mxu1 %v2035_v0  ;;  %s1755_s21 = sshll.u32 %s2434_s16, 5  ;;  %v2105_v12 = vld [vmem:[%s2429_s1 + $0x10] sm:$0xff]   ;;  %v2050_v51 = vmov 0.0   ;;  %vm2051_vm3 = vmmov 0   ;;  %v827_v52 = vld [vmem:[%s2431_s3] sm:$0xff]  ;;  %v2052_v53 = vmov 0  }
   0xd   : > { %1836 = vmatpush3.bf16.msra.mxu0 %v2035_v0  ;;  %1846 = vmatpush3.bf16.msra.mxu1 %v2035_v0  ;;  %s192_s24 = scalar_lea.vmem %s2428_s0, %s1755_s21  ;;  %vm843_vm4 = vcmask 1045504   ;;  %vm839_vm5 = vcmask 228352   ;;  %s1756_s5 = sshll.u32 %s2434_s16, 7 }
   0xe   : > { %1855 = vmatprep.subr.bf16.mxu0 %v2092_v1  ;;  %1865 = vmatprep.subr.bf16.mxu1 %v2092_v1  ;;  %v199_v2 = vld [vmem:[%s192_s24] sm:$0xff]   ;;  %v201_v3 = vld [vmem:[%s192_s24 + $0x8] sm:$0xff]   ;;  %v203_v4 = vld [vmem:[%s192_s24 + $0x10] sm:$0xff]   ;;  %s2375_s8 = scalar_lea.vmem %s2432_s4, %s1756_s5 }
   0xf   : > { %v207_v5 = vunpack.c.l.bf16 %v199_v2  ;;  %v208_v6 = vunpack.c.h.bf16 %v199_v2  ;;  %v209_v7 = vunpack.c.l.bf16 %v201_v3  ;;  %v210_v8 = vunpack.c.h.bf16 %v201_v3  ;;  %v205_v11 = vld [vmem:[%s192_s24 + $0x18] sm:$0xff]   ;;  %1837 = vmatprep.mubr.msk.bf16.mxu0 %vm261_vm2, %v199_v2  ;;  %2034 = vset.pattern.permute.xlu0 %v2052_v53 }
  0x10   : > { %v211_v9 = vunpack.c.l.bf16 %v203_v4  ;;  %v212_v10 = vunpack.c.h.bf16 %v203_v4  ;;  %v213_v13 = vunpack.c.l.bf16 %v205_v11  ;;  %v214_v14 = vunpack.c.h.bf16 %v205_v11  ;;  %1838 = vmatmul.mubr.msk.bf16.vlgmr.msra.gmra.mxu0 %vm261_vm2, %v201_v3  ;;  %836 = vperm.xlu0 %2034, %v827_v52  }
  0x11   : > { %216 = vst.msk [vmem:[#allocation2] sm:$0xf] %vm215_vm0, %v207_v5  ;;  %219 = vst.msk [vmem:[#allocation2 + $0x38] sm:$0xf] %vm215_vm0, %v208_v6  ;;  %1841 = vmatprep.mubr.msk.bf16.mxu0 %vm261_vm2, %v203_v4  ;;  %1856 = vmatpush3.bf16.msra.mxu0 %v2092_v1 }
  0x12   : > { %218 = vst.msk [vmem:[#allocation2 + $0x18] sm:$0xf0] %vm217_vm1, %v207_v5  ;;  %220 = vst.msk [vmem:[#allocation2 + $0x50] sm:$0xf0] %vm217_vm1, %v208_v6  ;;  %1875 = vmatprep.subr.bf16.mxu0 %v2105_v12 }
  0x13   : > { %221 = vst.msk [vmem:[#allocation2 + $0x70] sm:$0xf] %vm215_vm0, %v209_v7  ;;  %223 = vst.msk [vmem:[#allocation2 + $0xa8] sm:$0xf] %vm215_vm0, %v210_v8 }
  0x14   : > { %222 = vst.msk [vmem:[#allocation2 + $0x88] sm:$0xf0] %vm217_vm1, %v209_v7  ;;  %224 = vst.msk [vmem:[#allocation2 + $0xc0] sm:$0xf0] %vm217_vm1, %v210_v8 }
  0x15   : > { %225 = vst.msk [vmem:[#allocation2 + $0xe0] sm:$0xf] %vm215_vm0, %v211_v9  ;;  %227 = vst.msk [vmem:[#allocation2 + $0x118] sm:$0xf] %vm215_vm0, %v212_v10 }
  0x16   : > { %226 = vst.msk [vmem:[#allocation2 + $0xf8] sm:$0xf0] %vm217_vm1, %v211_v9  ;;  %228 = vst.msk [vmem:[#allocation2 + $0x130] sm:$0xf0] %vm217_vm1, %v212_v10 }
  0x17   : > { %229 = vst.msk [vmem:[#allocation2 + $0x150] sm:$0xf] %vm215_vm0, %v213_v13  ;;  %231 = vst.msk [vmem:[#allocation2 + $0x188] sm:$0xf] %vm215_vm0, %v214_v14 }
  0x18   : > { %230 = vst.msk [vmem:[#allocation2 + $0x168] sm:$0xf0] %vm217_vm1, %v213_v13  ;;  %232 = vst.msk [vmem:[#allocation2 + $0x1a0] sm:$0xf0] %vm217_vm1, %v214_v14  ;;  %1842 = vmatmul.mubr.msk.bf16.gmra.mxu0 %vm261_vm2, %v205_v11 }
  0x19   : > { %1857 = vmatprep.mubr.msk.bf16.mxu0 %vm261_vm2, %v199_v2 }
  0x20   : > { %1858 = vmatmul.mubr.msk.bf16.vlgmr.msra.gmra.mxu0 %vm261_vm2, %v201_v3 }
  0x21   : > { %1861 = vmatprep.mubr.msk.bf16.mxu0 %vm261_vm2, %v203_v4  ;;  %1876 = vmatpush3.bf16.msra.mxu0 %v2105_v12 }
  0x22   : > { %1895 = vmatprep.subr.bf16.mxu0 %v2050_v51 }
  0x28   : > { %1862 = vmatmul.mubr.msk.bf16.gmra.mxu0 %vm261_vm2, %v205_v11 }
  0x29   : > { %1877 = vmatprep.mubr.msk.bf16.mxu0 %vm261_vm2, %v199_v2 }
  0x30   : > { %1878 = vmatmul.mubr.msk.bf16.vlgmr.msra.gmra.mxu0 %vm261_vm2, %v201_v3 }
  0x31   : > { %1881 = vmatprep.mubr.msk.bf16.mxu0 %vm261_vm2, %v203_v4 }
  0x38   : > { %1882 = vmatmul.mubr.msk.bf16.gmra.mxu0 %vm261_vm2, %v205_v11 }
  0x39   : > { %1899 = vmatprep.mubr.msk.bf16.mxu0 %vm2051_vm3, %v2050_v51 }
  0xd0   : > { %v1839_v15 = vpop.f32.mrf.mxu0 }
  0xd1   : > { %343 = vst.msk [vmem:[#allocation2 + $0x74] sm:$0xf] %vm215_vm0, %v1839_v15 }
  0xd2   : > { %344 = vst.msk [vmem:[#allocation2 + $0x8c] sm:$0xf0] %vm217_vm1, %v1839_v15  ;;  %v308_v16 = vpop.f32.mrf.mxu0 }
  0xd3   : > { %339 = vst.msk [vmem:[#allocation2 + $0x4] sm:$0xf] %vm215_vm0, %v308_v16 }
  0xd4   : > { %340 = vst.msk [vmem:[#allocation2 + $0x1c] sm:$0xf0] %vm217_vm1, %v308_v16  ;;  %v1840_v17 = vpop.f32.mrf.mxu0 }
  0xd5   : > { %345 = vst.msk [vmem:[#allocation2 + $0xac] sm:$0xf] %vm215_vm0, %v1840_v17  ;;  %v356_v20 = vpack.c.bf16 %v1840_v17, %v1839_v15 }
  0xd6   : > { %346 = vst.msk [vmem:[#allocation2 + $0xc4] sm:$0xf0] %vm217_vm1, %v1840_v17  ;;  %v311_v18 = vpop.f32.mrf.mxu0 }
  0xd7   : > { %341 = vst.msk [vmem:[#allocation2 + $0x3c] sm:$0xf] %vm215_vm0, %v311_v18  ;;  %v355_v19 = vpack.c.bf16 %v311_v18, %v308_v16 }
  0xd8   : > { %342 = vst.msk [vmem:[#allocation2 + $0x54] sm:$0xf0] %vm217_vm1, %v311_v18  ;;  %v1843_v21 = vpop.f32.mrf.mxu0 }
  0xd9   : > { %351 = vst.msk [vmem:[#allocation2 + $0x154] sm:$0xf] %vm215_vm0, %v1843_v21  ;;  %1847 = vmatprep.mubr.msk.bf16.mxu1 %vm261_vm2, %v355_v19 }
  0xda   : > { %352 = vst.msk [vmem:[#allocation2 + $0x16c] sm:$0xf0] %vm217_vm1, %v1843_v21  ;;  %v324_v22 = vpop.f32.mrf.mxu0  ;;  %1848 = vmatmul.mubr.msk.bf16.vlgmr.msra.gmra.mxu1 %vm261_vm2, %v356_v20 }
  0xdb   : > { %347 = vst.msk [vmem:[#allocation2 + $0xe4] sm:$0xf] %vm215_vm0, %v324_v22  ;;  %1866 = vmatpush3.bf16.msra.mxu1 %v2092_v1 }
  0xdc   : > { %348 = vst.msk [vmem:[#allocation2 + $0xfc] sm:$0xf0] %vm217_vm1, %v324_v22  ;;  %v1844_v23 = vpop.f32.mrf.mxu0  ;;  %1885 = vmatprep.subr.bf16.mxu1 %v2105_v12 }
  0xdd   : > { %353 = vst.msk [vmem:[#allocation2 + $0x18c] sm:$0xf] %vm215_vm0, %v1844_v23  ;;  %v358_v26 = vpack.c.bf16 %v1844_v23, %v1843_v21 }
  0xde   : > { %354 = vst.msk [vmem:[#allocation2 + $0x1a4] sm:$0xf0] %vm217_vm1, %v1844_v23  ;;  %v327_v24 = vpop.f32.mrf.mxu0 }
  0xdf   : > { %349 = vst.msk [vmem:[#allocation2 + $0x11c] sm:$0xf] %vm215_vm0, %v327_v24  ;;  %v357_v25 = vpack.c.bf16 %v327_v24, %v324_v22 }
  0xe0   : > { %350 = vst.msk [vmem:[#allocation2 + $0x134] sm:$0xf0] %vm217_vm1, %v327_v24  ;;  %v1859_v27 = vpop.f32.mrf.mxu0 }
  0xe1   : > { %530 = vst.msk [vmem:[#allocation2 + $0x7c] sm:$0xf] %vm215_vm0, %v1859_v27  ;;  %1851 = vmatprep.mubr.msk.bf16.mxu1 %vm261_vm2, %v357_v25 }
  0xe2   : > { %531 = vst.msk [vmem:[#allocation2 + $0x94] sm:$0xf0] %vm217_vm1, %v1859_v27  ;;  %1852 = vmatmul.mubr.msk.bf16.gmra.mxu1 %vm261_vm2, %v358_v26  ;;  %v495_v28 = vpop.f32.mrf.mxu0  ;;  %v828_v26 = vld [vmem:[#allocation2] sm:$0xff] }
  0xe3   : > { %526 = vst.msk [vmem:[#allocation2 + $0xc] sm:$0xf] %vm215_vm0, %v495_v28 }
  0xe4   : > { %527 = vst.msk [vmem:[#allocation2 + $0x24] sm:$0xf0] %vm217_vm1, %v495_v28  ;;  %v1860_v29 = vpop.f32.mrf.mxu0 }
  0xe5   : > { %532 = vst.msk [vmem:[#allocation2 + $0xb4] sm:$0xf] %vm215_vm0, %v1860_v29  ;;  %v543_v32 = vpack.c.bf16 %v1860_v29, %v1859_v27  ;;  %v888_v27 = vld [vmem:[#allocation2 + $0x1c] sm:$0xff] }
  0xe6   : > { %533 = vst.msk [vmem:[#allocation2 + $0xcc] sm:$0xf0] %vm217_vm1, %v1860_v29  ;;  %v498_v30 = vpop.f32.mrf.mxu0 }
  0xe7   : > { %528 = vst.msk [vmem:[#allocation2 + $0x44] sm:$0xf] %vm215_vm0, %v498_v30  ;;  %v542_v31 = vpack.c.bf16 %v498_v30, %v495_v28 }
  0xe8   : > { %529 = vst.msk [vmem:[#allocation2 + $0x5c] sm:$0xf0] %vm217_vm1, %v498_v30  ;;  %v1863_v33 = vpop.f32.mrf.mxu0 }
  0xe9   : > { %538 = vst.msk [vmem:[#allocation2 + $0x15c] sm:$0xf] %vm215_vm0, %v1863_v33  ;;  %1867 = vmatprep.mubr.msk.bf16.mxu1 %vm261_vm2, %v542_v31 }
  0xea   : > { %539 = vst.msk [vmem:[#allocation2 + $0x174] sm:$0xf0] %vm217_vm1, %v1863_v33  ;;  %v511_v34 = vpop.f32.mrf.mxu0  ;;  %1868 = vmatmul.mubr.msk.bf16.vlgmr.msra.gmra.mxu1 %vm261_vm2, %v543_v32 }
  0xeb   : > { %534 = vst.msk [vmem:[#allocation2 + $0xec] sm:$0xf] %vm215_vm0, %v511_v34  ;;  %1886 = vmatpush3.bf16.msra.mxu1 %v2105_v12 }
  0xec   : > { %535 = vst.msk [vmem:[#allocation2 + $0x104] sm:$0xf0] %vm217_vm1, %v511_v34  ;;  %v1864_v35 = vpop.f32.mrf.mxu0  ;;  %1903 = vmatprep.subr.bf16.mxu1 %v2050_v51 }
  0xed   : > { %540 = vst.msk [vmem:[#allocation2 + $0x194] sm:$0xf] %vm215_vm0, %v1864_v35  ;;  %v545_v38 = vpack.c.bf16 %v1864_v35, %v1863_v33 }
  0xee   : > { %541 = vst.msk [vmem:[#allocation2 + $0x1ac] sm:$0xf0] %vm217_vm1, %v1864_v35  ;;  %v514_v36 = vpop.f32.mrf.mxu0 }
  0xef   : > { %536 = vst.msk [vmem:[#allocation2 + $0x124] sm:$0xf] %vm215_vm0, %v514_v36  ;;  %v544_v37 = vpack.c.bf16 %v514_v36, %v511_v34  ;;  %v2265_v34 = vld [vmem:[%s2430_s2] sm:$0xf] }
  0xf0   : > { %537 = vst.msk [vmem:[#allocation2 + $0x13c] sm:$0xf0] %vm217_vm1, %v514_v36  ;;  %v1879_v39 = vpop.f32.mrf.mxu0 }
  0xf1   : > { %717 = vst.msk [vmem:[#allocation2 + $0x84] sm:$0xf] %vm215_vm0, %v1879_v39  ;;  %1871 = vmatprep.mubr.msk.bf16.mxu1 %vm261_vm2, %v544_v37 }
  0xf2   : > { %718 = vst.msk [vmem:[#allocation2 + $0x9c] sm:$0xf0] %vm217_vm1, %v1879_v39  ;;  %1872 = vmatmul.mubr.msk.bf16.gmra.mxu1 %vm261_vm2, %v545_v38  ;;  %v682_v40 = vpop.f32.mrf.mxu0 }
  0xf3   : > { %713 = vst.msk [vmem:[#allocation2 + $0x14] sm:$0xf] %vm215_vm0, %v682_v40 }
  0xf4   : > { %714 = vst.msk [vmem:[#allocation2 + $0x2c] sm:$0xf0] %vm217_vm1, %v682_v40  ;;  %v1880_v41 = vpop.f32.mrf.mxu0 }
  0xf5   : > { %719 = vst.msk [vmem:[#allocation2 + $0xbc] sm:$0xf] %vm215_vm0, %v1880_v41  ;;  %v730_v44 = vpack.c.bf16 %v1880_v41, %v1879_v39 }
  0xf6   : > { %720 = vst.msk [vmem:[#allocation2 + $0xd4] sm:$0xf0] %vm217_vm1, %v1880_v41  ;;  %v685_v42 = vpop.f32.mrf.mxu0  ;;  %v938_v41 = vld [vmem:[#allocation2 + $0x38] sm:$0xff] }
  0xf7   : > { %715 = vst.msk [vmem:[#allocation2 + $0x4c] sm:$0xf] %vm215_vm0, %v685_v42  ;;  %v729_v43 = vpack.c.bf16 %v685_v42, %v682_v40 }
  0xf8   : > { %716 = vst.msk [vmem:[#allocation2 + $0x64] sm:$0xf0] %vm217_vm1, %v685_v42  ;;  %v1883_v45 = vpop.f32.mrf.mxu0  ;;  %v988_v42 = vld [vmem:[#allocation2 + $0x54] sm:$0xff] }
  0xf9   : > { %725 = vst.msk [vmem:[#allocation2 + $0x164] sm:$0xf] %vm215_vm0, %v1883_v45  ;;  %1887 = vmatprep.mubr.msk.bf16.mxu1 %vm261_vm2, %v729_v43 }
  0xfa   : > { %726 = vst.msk [vmem:[#allocation2 + $0x17c] sm:$0xf0] %vm217_vm1, %v1883_v45  ;;  %v698_v46 = vpop.f32.mrf.mxu0  ;;  %1888 = vmatmul.mubr.msk.bf16.vlgmr.msra.gmra.mxu1 %vm261_vm2, %v730_v44 }
  0xfb   : > { %721 = vst.msk [vmem:[#allocation2 + $0xf4] sm:$0xf] %vm215_vm0, %v698_v46 }
  0xfc   : > { %722 = vst.msk [vmem:[#allocation2 + $0x10c] sm:$0xf0] %vm217_vm1, %v698_v46  ;;  %v1884_v47 = vpop.f32.mrf.mxu0 }
  0xfd   : > { %727 = vst.msk [vmem:[#allocation2 + $0x19c] sm:$0xf] %vm215_vm0, %v1884_v47  ;;  %v732_v48 = vpack.c.bf16 %v1884_v47, %v1883_v45 }
  0xfe   : > { %728 = vst.msk [vmem:[#allocation2 + $0x1b4] sm:$0xf0] %vm217_vm1, %v1884_v47  ;;  %v701_v49 = vpop.f32.mrf.mxu0 }
  0xff   : > { %723 = vst.msk [vmem:[#allocation2 + $0x12c] sm:$0xf] %vm215_vm0, %v701_v49  ;;  %v731_v50 = vpack.c.bf16 %v701_v49, %v698_v46 }
 0x100   : > { %724 = vst.msk [vmem:[#allocation2 + $0x144] sm:$0xf0] %vm217_vm1, %v701_v49 }
 0x101   : > { %1891 = vmatprep.mubr.msk.bf16.mxu1 %vm261_vm2, %v731_v50 }
 0x102   : > { %1892 = vmatmul.mubr.msk.bf16.gmra.mxu1 %vm261_vm2, %v732_v48 }
 0x103   : > { %1907 = vmatprep.mubr.msk.bf16.mxu1 %vm2051_vm3, %v2050_v51 }
 0x19a   : > { %v1849_v54 = vpop.f32.mrf.mxu1 }
 0x19b   : > { %440 = vst.msk [vmem:[#allocation2 + $0x78] sm:$0xf] %vm215_vm0, %v1849_v54 }
 0x19c   : > { %441 = vst.msk [vmem:[#allocation2 + $0x90] sm:$0xf0] %vm217_vm1, %v1849_v54  ;;  %v405_v55 = vpop.f32.mrf.mxu1 }
 0x19d   : > { %436 = vst.msk [vmem:[#allocation2 + $0x8] sm:$0xf] %vm215_vm0, %v405_v55 }
 0x19e   : > { %437 = vst.msk [vmem:[#allocation2 + $0x20] sm:$0xf0] %vm217_vm1, %v405_v55  ;;  %v1850_v56 = vpop.f32.mrf.mxu1 }
 0x19f   : > { %442 = vst.msk [vmem:[#allocation2 + $0xb0] sm:$0xf] %vm215_vm0, %v1850_v56 }
 0x1a0   : > { %443 = vst.msk [vmem:[#allocation2 + $0xc8] sm:$0xf0] %vm217_vm1, %v1850_v56  ;;  %v408_v57 = vpop.f32.mrf.mxu1  ;;  %v1038_v56 = vld [vmem:[#allocation2 + $0x70] sm:$0xff] }
 0x1a1   : > { %438 = vst.msk [vmem:[#allocation2 + $0x40] sm:$0xf] %vm215_vm0, %v408_v57 }
 0x1a2   : > { %439 = vst.msk [vmem:[#allocation2 + $0x58] sm:$0xf0] %vm217_vm1, %v408_v57  ;;  %v1853_v58 = vpop.f32.mrf.mxu1  ;;  %v1039_v52 = vld [vmem:[#allocation2 + $0x78] sm:$0xff]  ;;  %v1088_v57 = vld [vmem:[#allocation2 + $0x8c] sm:$0xff] }
 0x1a3   : > { %448 = vst.msk [vmem:[#allocation2 + $0x158] sm:$0xf] %vm215_vm0, %v1853_v58  ;;  %v1089_v53 = vld [vmem:[#allocation2 + $0x94] sm:$0xff] }
 0x1a4   : > { %449 = vst.msk [vmem:[#allocation2 + $0x170] sm:$0xf0] %vm217_vm1, %v1853_v58  ;;  %v421_v59 = vpop.f32.mrf.mxu1  ;;  %v829_v21 = vld [vmem:[#allocation2 + $0x8] sm:$0xff]  ;;  %v1042_v58 = vpack.c.bf16 %v1039_v52, %v1038_v56 }
 0x1a5   : > { %444 = vst.msk [vmem:[#allocation2 + $0xe8] sm:$0xf] %vm215_vm0, %v421_v59  ;;  %v889_v22 = vld [vmem:[#allocation2 + $0x24] sm:$0xff]  ;;  %v832_v28 = vpack.c.bf16 %v829_v21, %v828_v26  ;;  %v1288_v21 = vld [vmem:[#allocation2 + $0xfc] sm:$0xff] }
 0x1a6   : > { %445 = vst.msk [vmem:[#allocation2 + $0x100] sm:$0xf0] %vm217_vm1, %v421_v59  ;;  %v1854_v60 = vpop.f32.mrf.mxu1  ;;  %v892_v29 = vpack.c.bf16 %v889_v22, %v888_v27  ;;  %v1092_v59 = vpack.c.bf16 %v1089_v53, %v1088_v57 }
 0x1a7   : > { %450 = vst.msk [vmem:[#allocation2 + $0x190] sm:$0xf] %vm215_vm0, %v1854_v60 }
 0x1a8   : > { %451 = vst.msk [vmem:[#allocation2 + $0x1a8] sm:$0xf0] %vm217_vm1, %v1854_v60  ;;  %v424_v61 = vpop.f32.mrf.mxu1  ;;  %v939_v37 = vld [vmem:[#allocation2 + $0x40] sm:$0xff] }
 0x1a9   : > { %446 = vst.msk [vmem:[#allocation2 + $0x120] sm:$0xf] %vm215_vm0, %v424_v61  ;;  %v989_v38 = vld [vmem:[#allocation2 + $0x5c] sm:$0xff]  ;;  %v942_v43 = vpack.c.bf16 %v939_v37, %v938_v41 }
 0x1aa   : > { %447 = vst.msk [vmem:[#allocation2 + $0x138] sm:$0xf0] %vm217_vm1, %v424_v61  ;;  %v1869_v62 = vpop.f32.mrf.mxu1  ;;  %v992_v44 = vpack.c.bf16 %v989_v38, %v988_v42 }
 0x1ab   : > { %627 = vst.msk [vmem:[#allocation2 + $0x80] sm:$0xf] %vm215_vm0, %v1869_v62 }
 0x1ac   : > { %628 = vst.msk [vmem:[#allocation2 + $0x98] sm:$0xf0] %vm217_vm1, %v1869_v62  ;;  %v592_v63 = vpop.f32.mrf.mxu1 }
 0x1ad   : > { %623 = vst.msk [vmem:[#allocation2 + $0x10] sm:$0xf] %vm215_vm0, %v592_v63 }
 0x1ae   : > { %624 = vst.msk [vmem:[#allocation2 + $0x28] sm:$0xf0] %vm217_vm1, %v592_v63  ;;  %v1870_v0 = vpop.f32.mrf.mxu1 }
 0x1af   : > { %629 = vst.msk [vmem:[#allocation2 + $0xb8] sm:$0xf] %vm215_vm0, %v1870_v0 }
 0x1b0   : > { %630 = vst.msk [vmem:[#allocation2 + $0xd0] sm:$0xf0] %vm217_vm1, %v1870_v0  ;;  %v595_v1 = vpop.f32.mrf.mxu1 }
 0x1b1   : > { %625 = vst.msk [vmem:[#allocation2 + $0x48] sm:$0xf] %vm215_vm0, %v595_v1 }
 0x1b2   : > { %626 = vst.msk [vmem:[#allocation2 + $0x60] sm:$0xf0] %vm217_vm1, %v595_v1  ;;  %v1873_v2 = vpop.f32.mrf.mxu1  ;;  %v1040_v45 = vld [vmem:[#allocation2 + $0x80] sm:$0xff] }
 0x1b3   : > { %635 = vst.msk [vmem:[#allocation2 + $0x160] sm:$0xf] %vm215_vm0, %v1873_v2  ;;  %v1090_v46 = vld [vmem:[#allocation2 + $0x9c] sm:$0xff] }
 0x1b4   : > { %636 = vst.msk [vmem:[#allocation2 + $0x178] sm:$0xf0] %vm217_vm1, %v1873_v2  ;;  %v608_v3 = vpop.f32.mrf.mxu1  ;;  %v830_v11 = vld [vmem:[#allocation2 + $0x10] sm:$0xff] }
 0x1b5   : > { %631 = vst.msk [vmem:[#allocation2 + $0xf0] sm:$0xf] %vm215_vm0, %v608_v3  ;;  %v890_v14 = vld [vmem:[#allocation2 + $0x2c] sm:$0xff] }
 0x1b6   : > { %632 = vst.msk [vmem:[#allocation2 + $0x108] sm:$0xf0] %vm217_vm1, %v608_v3  ;;  %v1874_v4 = vpop.f32.mrf.mxu1  ;;  %v1140_v60 = vld [vmem:[#allocation2 + $0xb8] sm:$0xff]  ;;  %v1139_v2 = vld [vmem:[#allocation2 + $0xb0] sm:$0xff] }
 0x1b7   : > { %637 = vst.msk [vmem:[#allocation2 + $0x198] sm:$0xf] %vm215_vm0, %v1874_v4  ;;  %v1190_v61 = vld [vmem:[#allocation2 + $0xd4] sm:$0xff]  ;;  %v1189_v3 = vld [vmem:[#allocation2 + $0xcc] sm:$0xff] }
 0x1b8   : > { %638 = vst.msk [vmem:[#allocation2 + $0x1b0] sm:$0xf0] %vm217_vm1, %v1874_v4  ;;  %v611_v5 = vpop.f32.mrf.mxu1  ;;  %v940_v30 = vld [vmem:[#allocation2 + $0x48] sm:$0xff] }
 0x1b9   : > { %633 = vst.msk [vmem:[#allocation2 + $0x128] sm:$0xf] %vm215_vm0, %v611_v5  ;;  %v990_v31 = vld [vmem:[#allocation2 + $0x64] sm:$0xff] }
 0x1ba   : > { %634 = vst.msk [vmem:[#allocation2 + $0x140] sm:$0xf0] %vm217_vm1, %v611_v5  ;;  %v1889_v6 = vpop.f32.mrf.mxu1 }
 0x1bb   : > { %814 = vst.msk [vmem:[#allocation2 + $0x88] sm:$0xf] %vm215_vm0, %v1889_v6 }
 0x1bc   : > { %815 = vst.msk [vmem:[#allocation2 + $0xa0] sm:$0xf0] %vm217_vm1, %v1889_v6  ;;  %v779_v7 = vpop.f32.mrf.mxu1  ;;  %v1138_v6 = vld [vmem:[#allocation2 + $0xa8] sm:$0xff] }
 0x1bd   : > { %810 = vst.msk [vmem:[#allocation2 + $0x18] sm:$0xf] %vm215_vm0, %v779_v7 }
 0x1be   : > { %811 = vst.msk [vmem:[#allocation2 + $0x30] sm:$0xf0] %vm217_vm1, %v779_v7  ;;  %v1890_v8 = vpop.f32.mrf.mxu1  ;;  %v1188_v7 = vld [vmem:[#allocation2 + $0xc4] sm:$0xff] }
 0x1bf   : > { %816 = vst.msk [vmem:[#allocation2 + $0xc0] sm:$0xf] %vm215_vm0, %v1890_v8 }
 0x1c0   : > { %817 = vst.msk [vmem:[#allocation2 + $0xd8] sm:$0xf0] %vm217_vm1, %v1890_v8  ;;  %v782_v9 = vpop.f32.mrf.mxu1  ;;  %v1142_v8 = vpack.c.bf16 %v1139_v2, %v1138_v6  ;;  %v2370_v2 = vpop.permute.xlu0 %836 }
 0x1c1   : > { %812 = vst.msk [vmem:[#allocation2 + $0x50] sm:$0xf] %vm215_vm0, %v782_v9 }
 0x1c2   : > { %813 = vst.msk [vmem:[#allocation2 + $0x68] sm:$0xf0] %vm217_vm1, %v782_v9  ;;  %v1893_v10 = vpop.f32.mrf.mxu1  ;;  %v1041_v39 = vld [vmem:[#allocation2 + $0x88] sm:$0xf]  ;;  %v1192_v9 = vpack.c.bf16 %v1189_v3, %v1188_v7 }
 0x1c3   : > { %822 = vst.msk [vmem:[#allocation2 + $0x168] sm:$0xf] %vm215_vm0, %v1893_v10  ;;  %v1091_v40 = vld [vmem:[#allocation2 + $0xa4] sm:$0xf]  ;;  %v1043_v47 = vpack.c.bf16 %v1041_v39, %v1040_v45  ;;  %v1439_v45 = vld [vmem:[#allocation2 + $0x158] sm:$0xff] }
 0x1c4   : > { %823 = vst.msk [vmem:[#allocation2 + $0x180] sm:$0xf0] %vm217_vm1, %v1893_v10  ;;  %v795_v12 = vpop.f32.mrf.mxu1  ;;  %v831_v13 = vld [vmem:[#allocation2 + $0x18] sm:$0xf]  ;;  %v1093_v48 = vpack.c.bf16 %v1091_v40, %v1090_v46  ;;  %v1240_v10 = vld [vmem:[#allocation2 + $0xf0] sm:$0xff]  ;;  %v1440_v39 = vld [vmem:[#allocation2 + $0x160] sm:$0xff] }
 0x1c5   : > { %v891_v15 = vld [vmem:[#allocation2 + $0x34] sm:$0xf]  ;;  %818 = vst.msk [vmem:[#allocation2 + $0xf8] sm:$0xf] %vm215_vm0, %v795_v12  ;;  %v833_v16 = vpack.c.bf16 %v831_v13, %v830_v11  ;;  %v1045_v49 = vsel %vm843_vm4, %v1043_v47, 0  ;;  %v1290_v11 = vld [vmem:[#allocation2 + $0x10c] sm:$0xff] }
 0x1c6   : > { %819 = vst.msk [vmem:[#allocation2 + $0x110] sm:$0xf0] %vm217_vm1, %v795_v12  ;;  %v893_v17 = vpack.c.bf16 %v891_v15, %v890_v14  ;;  %v1894_v18 = vpop.f32.mrf.mxu1  ;;  %v1095_v50 = vsel %vm843_vm4, %v1093_v48, 0  ;;  %v1141_v54 = vld [vmem:[#allocation2 + $0xc0] sm:$0xf]  ;;  %v1489_v46 = vld [vmem:[#allocation2 + $0x174] sm:$0xff] }
 0x1c7   : > { %824 = vst.msk [vmem:[#allocation2 + $0x1a0] sm:$0xf] %vm215_vm0, %v1894_v18  ;;  %v845_v19 = vsel %vm843_vm4, %v833_v16, 0  ;;  %v1191_v55 = vld [vmem:[#allocation2 + $0xdc] sm:$0xf]  ;;  %v1143_v62 = vpack.c.bf16 %v1141_v54, %v1140_v60  ;;  %v1239_v16 = vld [vmem:[#allocation2 + $0xe8] sm:$0xff] }
 0x1c8   : > { %825 = vst.msk [vmem:[#allocation2 + $0x1b8] sm:$0xf0] %vm217_vm1, %v1894_v18  ;;  %v895_v20 = vsel %vm843_vm4, %v893_v17, 0  ;;  %v798_v23 = vpop.f32.mrf.mxu1  ;;  %1896 = vmatpush3.bf16.msra.mxu0 %v845_v19  ;;  %v941_v24 = vld [vmem:[#allocation2 + $0x50] sm:$0xf]  ;;  %v1193_v63 = vpack.c.bf16 %v1191_v55, %v1190_v61  ;;  %v1289_v17 = vld [vmem:[#allocation2 + $0x104] sm:$0xff] }
 0x1c9   : > { %1904 = vmatpush3.bf16.msra.mxu1 %v895_v20  ;;  %v991_v25 = vld [vmem:[#allocation2 + $0x6c] sm:$0xf]  ;;  %820 = vst.msk [vmem:[#allocation2 + $0x130] sm:$0xf] %vm215_vm0, %v798_v23  ;;  %1897 = vmatprep.subr.bf16.mxu0 %v2050_v51  ;;  %v943_v32 = vpack.c.bf16 %v941_v24, %v940_v30  ;;  %v1145_v0 = vsel %vm843_vm4, %v1143_v62, 0  ;;  %v1238_v20 = vld [vmem:[#allocation2 + $0xe0] sm:$0xff] }
 0x1ca   : > { %821 = vst.msk [vmem:[#allocation2 + $0x148] sm:$0xf0] %vm217_vm1, %v798_v23  ;;  %1905 = vmatprep.subr.bf16.mxu1 %v2050_v51  ;;  %v993_v33 = vpack.c.bf16 %v991_v25, %v990_v31  ;;  %v1195_v1 = vsel %vm843_vm4, %v1193_v63, 0  ;;  %v1242_v22 = vpack.c.bf16 %v1239_v16, %v1238_v20  ;;  %v1292_v23 = vpack.c.bf16 %v1289_v17, %v1288_v21  ;;  %v1340_v24 = vld [vmem:[#allocation2 + $0x128] sm:$0xff]  ;;  %v1339_v30 = vld [vmem:[#allocation2 + $0x120] sm:$0xff]  ;;  %v1540_v54 = vld [vmem:[#allocation2 + $0x198] sm:$0xff] }
 0x1cb   : > { %v945_v35 = vsel %vm843_vm4, %v943_v32, 0  ;;  %v1390_v25 = vld [vmem:[#allocation2 + $0x144] sm:$0xff]  ;;  %v1389_v31 = vld [vmem:[#allocation2 + $0x13c] sm:$0xff]  ;;  %v1590_v55 = vld [vmem:[#allocation2 + $0x1b4] sm:$0xff] }
 0x1cc   : > { %1898 = vmatpush3.bf16.msra.mxu0 %v832_v28  ;;  %v995_v36 = vsel %vm843_vm4, %v993_v33, 0  ;;  %v1241_v4 = vld [vmem:[#allocation2 + $0xf8] sm:$0xf]  ;;  %v1441_v32 = vld [vmem:[#allocation2 + $0x168] sm:$0xf]  ;;  %v1490_v40 = vld [vmem:[#allocation2 + $0x17c] sm:$0xff] }
 0x1cd   : > { %1906 = vmatpush3.bf16.msra.mxu1 %v892_v29  ;;  %1911 = vmatprep.subr.bf16.mxu0 %v2050_v51  ;;  %v1291_v5 = vld [vmem:[#allocation2 + $0x114] sm:$0xf]  ;;  %v1243_v12 = vpack.c.bf16 %v1241_v4, %v1240_v10  ;;  %v1491_v33 = vld [vmem:[#allocation2 + $0x184] sm:$0xf]  ;;  %v1443_v41 = vpack.c.bf16 %v1441_v32, %v1440_v39  ;;  %v1589_v61 = vld [vmem:[#allocation2 + $0x1ac] sm:$0xff] }
 0x1ce   : > { %1919 = vmatprep.subr.bf16.mxu1 %v2050_v51  ;;  %v1293_v13 = vpack.c.bf16 %v1291_v5, %v1290_v11  ;;  %v1493_v42 = vpack.c.bf16 %v1491_v33, %v1490_v40  ;;  %v1541_v47 = vld [vmem:[#allocation2 + $0x1a0] sm:$0xf]  ;;  %v1539_v60 = vld [vmem:[#allocation2 + $0x190] sm:$0xff]  ;;  %v1538_v62 = vld [vmem:[#allocation2 + $0x188] sm:$0xff] }
 0x1cf   : > { %1900 = vmatmul.mubr.msk.bf16.vlgmr.msra.gmra.mxu0 %vm839_vm5, %v2265_v34  ;;  %v1245_v14 = vsel %vm843_vm4, %v1243_v12, 0  ;;  %v1591_v48 = vld [vmem:[#allocation2 + $0x1bc] sm:$0xf]  ;;  %v1543_v56 = vpack.c.bf16 %v1541_v47, %v1540_v54  ;;  %v1588_v63 = vld [vmem:[#allocation2 + $0x1a4] sm:$0xff] }
 0x1d0   : > { %1908 = vmatmul.mubr.msk.bf16.vlgmr.msra.gmra.mxu1 %vm839_vm5, %v2265_v34  ;;  %1912 = vmatpush3.bf16.msra.mxu0 %v945_v35  ;;  %v1295_v15 = vsel %vm843_vm4, %v1293_v13, 0  ;;  %v1341_v18 = vld [vmem:[#allocation2 + $0x130] sm:$0xf]  ;;  %v1338_v35 = vld [vmem:[#allocation2 + $0x118] sm:$0xff]  ;;  %v1593_v57 = vpack.c.bf16 %v1591_v48, %v1590_v55 }
 0x1d1   : > { %1920 = vmatpush3.bf16.msra.mxu1 %v995_v36  ;;  %1913 = vmatprep.subr.bf16.mxu0 %v2050_v51  ;;  %v1391_v19 = vld [vmem:[#allocation2 + $0x14c] sm:$0xf]  ;;  %v1343_v26 = vpack.c.bf16 %v1341_v18, %v1340_v24  ;;  %v1388_v36 = vld [vmem:[#allocation2 + $0x134] sm:$0xff]  ;;  %v1342_v37 = vpack.c.bf16 %v1339_v30, %v1338_v35 }
 0x1d2   : > { %1921 = vmatprep.subr.bf16.mxu1 %v2050_v51  ;;  %1915 = vmatprep.mubr.msk.bf16.mxu0 %vm2051_vm3, %v2050_v51  ;;  %v1393_v27 = vpack.c.bf16 %v1391_v19, %v1390_v25  ;;  %v1392_v38 = vpack.c.bf16 %v1389_v31, %v1388_v36 }
 0x1d3   : > { %1923 = vmatprep.mubr.msk.bf16.mxu1 %vm2051_vm3, %v2050_v51  ;;  %v1345_v28 = vsel %vm843_vm4, %v1343_v26, 0 }
 0x1d4   : > { %1914 = vmatpush3.bf16.msra.mxu0 %v942_v43  ;;  %v1395_v29 = vsel %vm843_vm4, %v1393_v27, 0  ;;  %v1445_v43 = vsel %vm843_vm4, %v1443_v41, 0 }
 0x1d5   : > { %1922 = vmatpush3.bf16.msra.mxu1 %v992_v44  ;;  %1927 = vmatprep.subr.bf16.mxu0 %v2050_v51  ;;  %v1495_v44 = vsel %vm843_vm4, %v1493_v42, 0 }
 0x1d6   : > { %1935 = vmatprep.subr.bf16.mxu1 %v2050_v51 }
 0x1d7   : > { %1916 = vmatmul.mubr.msk.bf16.vlgmr.msra.gmra.mxu0 %vm839_vm5, %v2265_v34 }
 0x1d8   : > { %1924 = vmatmul.mubr.msk.bf16.vlgmr.msra.gmra.mxu1 %vm839_vm5, %v2265_v34  ;;  %1928 = vmatpush3.bf16.msra.mxu0 %v1045_v49  ;;  %v1438_v49 = vld [vmem:[#allocation2 + $0x150] sm:$0xff] }
 0x1d9   : > { %1936 = vmatpush3.bf16.msra.mxu1 %v1095_v50  ;;  %1929 = vmatprep.subr.bf16.mxu0 %v2050_v51  ;;  %v1488_v50 = vld [vmem:[#allocation2 + $0x16c] sm:$0xff]  ;;  %v1442_v52 = vpack.c.bf16 %v1439_v45, %v1438_v49 }
 0x1da   : > { %1937 = vmatprep.subr.bf16.mxu1 %v2050_v51  ;;  %1931 = vmatprep.mubr.msk.bf16.mxu0 %vm2051_vm3, %v2050_v51  ;;  %v1492_v53 = vpack.c.bf16 %v1489_v46, %v1488_v50 }
 0x1db   : > { %1939 = vmatprep.mubr.msk.bf16.mxu1 %vm2051_vm3, %v2050_v51 }
 0x1dc   : > { %1930 = vmatpush3.bf16.msra.mxu0 %v1042_v58  ;;  %v1545_v58 = vsel %vm843_vm4, %v1543_v56, 0 }
 0x1dd   : > { %1938 = vmatpush3.bf16.msra.mxu1 %v1092_v59  ;;  %1943 = vmatprep.subr.bf16.mxu0 %v2050_v51  ;;  %v1595_v59 = vsel %vm843_vm4, %v1593_v57, 0 }
 0x1de   : > { %1951 = vmatprep.subr.bf16.mxu1 %v2050_v51 }
 0x1df   : > { %1932 = vmatmul.mubr.msk.bf16.vlgmr.msra.gmra.mxu0 %vm839_vm5, %v2265_v34 }
 0x1e0   : > { %1940 = vmatmul.mubr.msk.bf16.vlgmr.msra.gmra.mxu1 %vm839_vm5, %v2265_v34  ;;  %1944 = vmatpush3.bf16.msra.mxu0 %v1145_v0  ;;  %v1542_v0 = vpack.c.bf16 %v1539_v60, %v1538_v62 }
 0x1e1   : > { %1952 = vmatpush3.bf16.msra.mxu1 %v1195_v1  ;;  %1945 = vmatprep.subr.bf16.mxu0 %v2050_v51  ;;  %v1592_v1 = vpack.c.bf16 %v1589_v61, %v1588_v63 }
 0x1e2   : > { %1953 = vmatprep.subr.bf16.mxu1 %v2050_v51  ;;  %1947 = vmatprep.mubr.msk.bf16.mxu0 %vm2051_vm3, %v2050_v51 }
 0x1e3   : > { %1955 = vmatprep.mubr.msk.bf16.mxu1 %vm2051_vm3, %v2050_v51 }
 0x1e4   : > { %1946 = vmatpush3.bf16.msra.mxu0 %v1142_v8 }
 0x1e5   : > { %1954 = vmatpush3.bf16.msra.mxu1 %v1192_v9  ;;  %1959 = vmatprep.subr.bf16.mxu0 %v2050_v51 }
 0x1e6   : > { %1967 = vmatprep.subr.bf16.mxu1 %v2050_v51 }
 0x1e7   : > { %1948 = vmatmul.mubr.msk.bf16.vlgmr.msra.gmra.mxu0 %vm839_vm5, %v2265_v34 }
 0x1e8   : > { %1956 = vmatmul.mubr.msk.bf16.vlgmr.msra.gmra.mxu1 %vm839_vm5, %v2265_v34  ;;  %1960 = vmatpush3.bf16.msra.mxu0 %v1245_v14 }
 0x1e9   : > { %1968 = vmatpush3.bf16.msra.mxu1 %v1295_v15  ;;  %1961 = vmatprep.subr.bf16.mxu0 %v2050_v51 }
 0x1ea   : > { %1969 = vmatprep.subr.bf16.mxu1 %v2050_v51  ;;  %1963 = vmatprep.mubr.msk.bf16.mxu0 %vm2051_vm3, %v2050_v51 }
 0x1eb   : > { %1971 = vmatprep.mubr.msk.bf16.mxu1 %vm2051_vm3, %v2050_v51 }
 0x1ec   : > { %1962 = vmatpush3.bf16.msra.mxu0 %v1242_v22 }
 0x1ed   : > { %1970 = vmatpush3.bf16.msra.mxu1 %v1292_v23  ;;  %1975 = vmatprep.subr.bf16.mxu0 %v2050_v51 }
 0x1ee   : > { %1983 = vmatprep.subr.bf16.mxu1 %v2050_v51 }
 0x1ef   : > { %1964 = vmatmul.mubr.msk.bf16.vlgmr.msra.gmra.mxu0 %vm839_vm5, %v2265_v34 }
 0x1f0   : > { %1972 = vmatmul.mubr.msk.bf16.vlgmr.msra.gmra.mxu1 %vm839_vm5, %v2265_v34  ;;  %1976 = vmatpush3.bf16.msra.mxu0 %v1345_v28 }
 0x1f1   : > { %1984 = vmatpush3.bf16.msra.mxu1 %v1395_v29  ;;  %1977 = vmatprep.subr.bf16.mxu0 %v2050_v51 }
 0x1f2   : > { %1985 = vmatprep.subr.bf16.mxu1 %v2050_v51  ;;  %1979 = vmatprep.mubr.msk.bf16.mxu0 %vm2051_vm3, %v2050_v51 }
 0x1f3   : > { %1987 = vmatprep.mubr.msk.bf16.mxu1 %vm2051_vm3, %v2050_v51 }
 0x1f4   : > { %1978 = vmatpush3.bf16.msra.mxu0 %v1342_v37 }
 0x1f5   : > { %1986 = vmatpush3.bf16.msra.mxu1 %v1392_v38  ;;  %1991 = vmatprep.subr.bf16.mxu0 %v2050_v51 }
 0x1f6   : > { %1999 = vmatprep.subr.bf16.mxu1 %v2050_v51 }
 0x1f7   : > { %1980 = vmatmul.mubr.msk.bf16.vlgmr.msra.gmra.mxu0 %vm839_vm5, %v2265_v34 }
 0x1f8   : > { %1988 = vmatmul.mubr.msk.bf16.vlgmr.msra.gmra.mxu1 %vm839_vm5, %v2265_v34  ;;  %1992 = vmatpush3.bf16.msra.mxu0 %v1445_v43 }
 0x1f9   : > { %2000 = vmatpush3.bf16.msra.mxu1 %v1495_v44  ;;  %1993 = vmatprep.subr.bf16.mxu0 %v2050_v51 }
 0x1fa   : > { %2001 = vmatprep.subr.bf16.mxu1 %v2050_v51  ;;  %1995 = vmatprep.mubr.msk.bf16.mxu0 %vm2051_vm3, %v2050_v51 }
 0x1fb   : > { %2003 = vmatprep.mubr.msk.bf16.mxu1 %vm2051_vm3, %v2050_v51 }
 0x1fc   : > { %1994 = vmatpush3.bf16.msra.mxu0 %v1442_v52 }
 0x1fd   : > { %2002 = vmatpush3.bf16.msra.mxu1 %v1492_v53  ;;  %2007 = vmatprep.subr.bf16.mxu0 %v2050_v51 }
 0x1fe   : > { %2015 = vmatprep.subr.bf16.mxu1 %v2050_v51 }
 0x1ff   : > { %1996 = vmatmul.mubr.msk.bf16.vlgmr.msra.gmra.mxu0 %vm839_vm5, %v2265_v34 }
 0x200   : > { %2004 = vmatmul.mubr.msk.bf16.vlgmr.msra.gmra.mxu1 %vm839_vm5, %v2265_v34  ;;  %2008 = vmatpush3.bf16.msra.mxu0 %v1545_v58 }
 0x201   : > { %2016 = vmatpush3.bf16.msra.mxu1 %v1595_v59  ;;  %2009 = vmatprep.subr.bf16.mxu0 %v2050_v51 }
 0x202   : > { %2017 = vmatprep.subr.bf16.mxu1 %v2050_v51  ;;  %2011 = vmatprep.mubr.msk.bf16.mxu0 %vm2051_vm3, %v2050_v51 }
 0x203   : > { %2019 = vmatprep.mubr.msk.bf16.mxu1 %vm2051_vm3, %v2050_v51 }
 0x204   : > { %2010 = vmatpush3.bf16.msra.mxu0 %v1542_v0 }
 0x205   : > { %2018 = vmatpush3.bf16.msra.mxu1 %v1592_v1 }
 0x207   : > { %2012 = vmatmul.mubr.msk.bf16.vlgmr.msra.gmra.mxu0 %vm839_vm5, %v2265_v34 }
 0x208   : > { %2020 = vmatmul.mubr.msk.bf16.vlgmr.msra.gmra.mxu1 %vm839_vm5, %v2265_v34 }
 0x28f   : > { %v881_v3 = vpop.f32.mrf.mxu0 }
 0x290   : > { %v931_v51 = vpop.f32.mrf.mxu1  ;;  %v882_v4 = vadd.f32 %v881_v3, %v2370_v2 }
 0x291   : > { %v932_v5 = vadd.f32 %v931_v51, %v2370_v2  ;;  %v1901_v6 = vpop.f32.mrf.mxu0 }
 0x292   : > { %v1909_v34 = vpop.f32.mrf.mxu1  ;;  %887 = vst.msk [vmem:[%s2375_s8] sm:$0xff] %vm261_vm2, %v882_v4 }
 0x293   : > { %937 = vst.msk [vmem:[%s2375_s8 + $0x8] sm:$0xff] %vm261_vm2, %v932_v5  ;;  %v884_v7 = vpop.f32.mrf.mxu0 }
 0x294   : > { %v934_v8 = vpop.f32.mrf.mxu1 }
 0x295   : > { %v1902_v9 = vpop.f32.mrf.mxu0 }
 0x296   : > { %v1910_v10 = vpop.f32.mrf.mxu1 }
 0x297   : > { %v981_v11 = vpop.f32.mrf.mxu0 }
 0x298   : > { %v1031_v12 = vpop.f32.mrf.mxu1  ;;  %v982_v13 = vadd.f32 %v981_v11, %v2370_v2 }
 0x299   : > { %v1032_v14 = vadd.f32 %v1031_v12, %v2370_v2  ;;  %v1917_v15 = vpop.f32.mrf.mxu0 }
 0x29a   : > { %v1925_v16 = vpop.f32.mrf.mxu1  ;;  %987 = vst.msk [vmem:[%s2375_s8 + $0x10] sm:$0xff] %vm261_vm2, %v982_v13 }
 0x29b   : > { %1037 = vst.msk [vmem:[%s2375_s8 + $0x18] sm:$0xff] %vm261_vm2, %v1032_v14  ;;  %v984_v17 = vpop.f32.mrf.mxu0 }
 0x29c   : > { %v1034_v18 = vpop.f32.mrf.mxu1 }
 0x29d   : > { %v1918_v19 = vpop.f32.mrf.mxu0 }
 0x29e   : > { %v1926_v20 = vpop.f32.mrf.mxu1 }
 0x29f   : > { %v1081_v21 = vpop.f32.mrf.mxu0 }
 0x2a0   : > { %v1131_v22 = vpop.f32.mrf.mxu1  ;;  %v1082_v23 = vadd.f32 %v1081_v21, %v2370_v2 }
 0x2a1   : > { %v1132_v24 = vadd.f32 %v1131_v22, %v2370_v2  ;;  %v1933_v25 = vpop.f32.mrf.mxu0 }
 0x2a2   : > { %v1941_v26 = vpop.f32.mrf.mxu1  ;;  %1087 = vst.msk [vmem:[%s2375_s8 + $0x20] sm:$0xff] %vm261_vm2, %v1082_v23 }
 0x2a3   : > { %1137 = vst.msk [vmem:[%s2375_s8 + $0x28] sm:$0xff] %vm261_vm2, %v1132_v24  ;;  %v1084_v27 = vpop.f32.mrf.mxu0 }
 0x2a4   : > { %v1134_v28 = vpop.f32.mrf.mxu1 }
 0x2a5   : > { %v1934_v29 = vpop.f32.mrf.mxu0 }
 0x2a6   : > { %v1942_v30 = vpop.f32.mrf.mxu1 }
 0x2a7   : > { %v1181_v31 = vpop.f32.mrf.mxu0 }
 0x2a8   : > { %v1231_v32 = vpop.f32.mrf.mxu1  ;;  %v1182_v33 = vadd.f32 %v1181_v31, %v2370_v2 }
 0x2a9   : > { %v1232_v35 = vadd.f32 %v1231_v32, %v2370_v2  ;;  %v1949_v36 = vpop.f32.mrf.mxu0 }
 0x2aa   : > { %v1957_v37 = vpop.f32.mrf.mxu1  ;;  %1187 = vst.msk [vmem:[%s2375_s8 + $0x30] sm:$0xff] %vm261_vm2, %v1182_v33 }
 0x2ab   : > { %1237 = vst.msk [vmem:[%s2375_s8 + $0x38] sm:$0xff] %vm261_vm2, %v1232_v35  ;;  %v1184_v38 = vpop.f32.mrf.mxu0 }
 0x2ac   : > { %v1234_v39 = vpop.f32.mrf.mxu1 }
 0x2ad   : > { %v1950_v40 = vpop.f32.mrf.mxu0 }
 0x2ae   : > { %v1958_v41 = vpop.f32.mrf.mxu1 }
 0x2af   : > { %v1281_v42 = vpop.f32.mrf.mxu0 }
 0x2b0   : > { %v1331_v43 = vpop.f32.mrf.mxu1  ;;  %v1282_v44 = vadd.f32 %v1281_v42, %v2370_v2 }
 0x2b1   : > { %v1332_v45 = vadd.f32 %v1331_v43, %v2370_v2  ;;  %v1965_v46 = vpop.f32.mrf.mxu0 }
 0x2b2   : > { %v1973_v47 = vpop.f32.mrf.mxu1  ;;  %1287 = vst.msk [vmem:[%s2375_s8 + $0x40] sm:$0xff] %vm261_vm2, %v1282_v44 }
 0x2b3   : > { %1337 = vst.msk [vmem:[%s2375_s8 + $0x48] sm:$0xff] %vm261_vm2, %v1332_v45  ;;  %v1284_v48 = vpop.f32.mrf.mxu0 }
 0x2b4   : > { %v1334_v49 = vpop.f32.mrf.mxu1 }
 0x2b5   : > { %v1966_v50 = vpop.f32.mrf.mxu0 }
 0x2b6   : > { %v1974_v52 = vpop.f32.mrf.mxu1 }
 0x2b7   : > { %v1381_v53 = vpop.f32.mrf.mxu0 }
 0x2b8   : > { %v1431_v54 = vpop.f32.mrf.mxu1  ;;  %v1382_v55 = vadd.f32 %v1381_v53, %v2370_v2 }
 0x2b9   : > { %v1432_v56 = vadd.f32 %v1431_v54, %v2370_v2  ;;  %v1981_v57 = vpop.f32.mrf.mxu0 }
 0x2ba   : > { %v1989_v58 = vpop.f32.mrf.mxu1  ;;  %1387 = vst.msk [vmem:[%s2375_s8 + $0x50] sm:$0xff] %vm261_vm2, %v1382_v55 }
 0x2bb   : > { %1437 = vst.msk [vmem:[%s2375_s8 + $0x58] sm:$0xff] %vm261_vm2, %v1432_v56  ;;  %v1384_v59 = vpop.f32.mrf.mxu0 }
 0x2bc   : > { %v1434_v60 = vpop.f32.mrf.mxu1 }
 0x2bd   : > { %v1982_v61 = vpop.f32.mrf.mxu0 }
 0x2be   : > { %v1990_v62 = vpop.f32.mrf.mxu1 }
 0x2bf   : > { %v1481_v63 = vpop.f32.mrf.mxu0 }
 0x2c0   : > { %v1531_v0 = vpop.f32.mrf.mxu1  ;;  %v1482_v1 = vadd.f32 %v1481_v63, %v2370_v2 }
 0x2c1   : > { %v1532_v3 = vadd.f32 %v1531_v0, %v2370_v2  ;;  %v1997_v51 = vpop.f32.mrf.mxu0 }
 0x2c2   : > { %v2005_v4 = vpop.f32.mrf.mxu1  ;;  %1487 = vst.msk [vmem:[%s2375_s8 + $0x60] sm:$0xff] %vm261_vm2, %v1482_v1 }
 0x2c3   : > { %1537 = vst.msk [vmem:[%s2375_s8 + $0x68] sm:$0xff] %vm261_vm2, %v1532_v3  ;;  %v1484_v5 = vpop.f32.mrf.mxu0 }
 0x2c4   : > { %v1534_v6 = vpop.f32.mrf.mxu1 }
 0x2c5   : > { %v1998_v34 = vpop.f32.mrf.mxu0 }
 0x2c6   : > { %v2006_v7 = vpop.f32.mrf.mxu1 }
 0x2c7   : > { %v1581_v8 = vpop.f32.mrf.mxu0 }
 0x2c8   : > { %v1631_v9 = vpop.f32.mrf.mxu1  ;;  %v1582_v10 = vadd.f32 %v1581_v8, %v2370_v2 }
 0x2c9   : > { %v1632_v11 = vadd.f32 %v1631_v9, %v2370_v2  ;;  %v2013_v12 = vpop.f32.mrf.mxu0 }
 0x2ca   : > { %v2021_v13 = vpop.f32.mrf.mxu1  ;;  %1587 = vst.msk [vmem:[%s2375_s8 + $0x70] sm:$0xff] %vm261_vm2, %v1582_v10 }
 0x2cb   : > { %1637 = vst.msk [vmem:[%s2375_s8 + $0x78] sm:$0xff] %vm261_vm2, %v1632_v11  ;;  %v1584_v14 = vpop.f32.mrf.mxu0 }
 0x2cc   : > { %v1634_v15 = vpop.f32.mrf.mxu1 }
 0x2cd   : > { %v2014_v16 = vpop.f32.mrf.mxu0 }
 0x2ce   : > { %v2022_v17 = vpop.f32.mrf.mxu1 }
 0x2cf PF: > { %s14_s15 = sadd.s32 1, %s2048_s15  }
 0x2d0   : > { %p11_p4 = scmp.ge.s32.totalorder %s14_s15, 4  }
 0x2d2   :  { %13 = sbr.rel (!%p11_p4) target bundleno = 1 (0x1), region = 68 }

</bundles_post_ra>
